<compile_context>
chip_gen: v6e
topology: v6e:2x2x1
jax: 0.10.0
libtpu: 0.0.40
codegen_flags: <defaults>
</compile_context>

<pallas_src>
import functools
import math

import jax
import jax.numpy as jnp
from jax.experimental import pallas as pl
from jax.experimental.pallas import tpu as pltpu

# ----------------------------- small BERT config ----------------------------
VOCAB_SIZE = 128
MAX_POS = 32
HIDDEN = 64
NUM_HEADS = 2
HEAD_DIM = HIDDEN // NUM_HEADS
INTERMEDIATE = 128
NUM_LAYERS = 2
NUM_LABELS = 3
LN_EPS = 1e-12

HP = 128          # hidden padded to a full 128-lane vreg (lane-dense stores)
LP = 128          # label dim padded to 128 lanes for the classifier output

BATCH = 2
SEQ = 16

# ------------------------- packed bias/LN vector slab ------------------------
ROW_EMB_G = 0
ROW_EMB_B = 1
ROW_CLS_B = 2
ROW_LAYER_BASE = 3
ROWS_PER_LAYER = 10
(R_BQ, R_BK, R_BV, R_BO, R_LN1G, R_LN1B,
 R_BI, R_BO2, R_LN2G, R_LN2B) = range(ROWS_PER_LAYER)


# ------------------------------- in-kernel helpers --------------------------
def _masked_layernorm(x, gamma, beta, hmask, inv_h):
    """LayerNorm over the real HIDDEN features of a zero-padded (rows, HP) slab."""
    mean = jnp.sum(x, axis=-1, keepdims=True) * inv_h          # pad cols are zero
    cen = (x - mean) * hmask                                   # re-zero pad cols
    var = jnp.sum(cen * cen, axis=-1, keepdims=True) * inv_h
    return cen * jax.lax.rsqrt(var + LN_EPS) * gamma + beta    # gamma/beta pad = 0


def _gelu(x):
    # TODO(synk): HF BERT default is exact erf-GELU; tanh approximation used
    # because erf lowering in Mosaic is not guaranteed.
    return 0.5 * x * (1.0 + jnp.tanh(0.7978845608028654 * (x + 0.044715 * x * x * x)))


# ------------------------------ fused kernel body ---------------------------
def bert_fused_kernel(
    x_ref, mask_ref, vec_ref,
    wqkv_ref, wo_ref, wi_ref, wo2_ref, wc_ref,
    hid_ref, logits_ref,
    *, batch, seq, hidden, num_heads, head_dim, num_layers,
):
    f32 = jnp.float32
    bf16 = jnp.bfloat16
    bs = batch * seq
    hp = x_ref.shape[-1]
    inv_h = 1.0 / hidden

    vecs = vec_ref[...]                                   # (rows, HP) f32, resident

    # ---- hoisted constants (computed once, shared by all layers/heads) ------
    lane = jax.lax.broadcasted_iota(jnp.int32, (1, hp), 1)
    hmask = (lane < hidden).astype(f32)
    head_masks = [((lane >= hd * head_dim) & (lane < (hd + 1) * head_dim)).astype(f32)
                  for hd in range(num_heads)]

    # Block-diagonal additive attention bias over flattened (BS, BS) scores:
    # cross-batch pairs -> -3e4 (exp underflows to exactly 0), padded keys -> -1e4.
    ri = jax.lax.broadcasted_iota(jnp.int32, (bs, bs), 0)
    ci = jax.lax.broadcasted_iota(jnp.int32, (bs, bs), 1)
    same = None
    for b in range(batch):           # no integer div; pure VPU compares, hoisted
        lo, hi = b * seq, (b + 1) * seq
        in_b = (ri >= lo) & (ri < hi) & (ci >= lo) & (ci < hi)
        same = in_b if same is None else (same | in_b)
    pad_bias = (1.0 - mask_ref[...]) * -10000.0                 # (1, BS)
    bias = jnp.where(same, pad_bias, -30000.0)                  # (BS, BS)
    bias = jnp.concatenate([bias] * num_heads, axis=0)          # (NH*BS, BS)

    # ---- embedding LayerNorm -------------------------------------------------
    h = _masked_layernorm(x_ref[...], vecs[ROW_EMB_G], vecs[ROW_EMB_B], hmask, inv_h)

    # ---- encoder layers (weights resident in VMEM, layer loop unrolled) ------
    for li in range(num_layers):
        base = ROW_LAYER_BASE + li * ROWS_PER_LAYER
        xin = h
        x16 = xin.astype(bf16)

        # fused QKV projection: (BS, HP) @ (HP, 3*HP)   [1/sqrt(d) folded in Wq/bq]
        qkv = jnp.dot(x16, wqkv_ref[li], preferred_element_type=f32)
        q = qkv[:, 0:hp] + vecs[base + R_BQ]                       # (BS, HP) f32
        k = (qkv[:, hp:2 * hp] + vecs[base + R_BK]).astype(bf16)   # (BS, HP)
        v = (qkv[:, 2 * hp:3 * hp] + vecs[base + R_BV]).astype(bf16)

        # Heads stacked on the sublane axis, lane-masked q, full-K=128 contraction.
        qcat = jnp.concatenate([q * head_masks[hd] for hd in range(num_heads)],
                               axis=0).astype(bf16)                # (NH*BS, HP)
        s = jax.lax.dot_general(qcat, k, (((1,), (1,)), ((), ())),
                                preferred_element_type=f32) + bias # (NH*BS, BS)

        # single softmax chain for all heads / batches
        s = s - jnp.max(s, axis=-1, keepdims=True)
        p = jnp.exp(s)
        p = p * pl.reciprocal(jnp.sum(p, axis=-1, keepdims=True), approx=True)

        # one ctx matmul for all heads, then lane-masked head recombination
        ctx_stack = jnp.dot(p.astype(bf16), v, preferred_element_type=f32)  # (NH*BS, HP)
        ctx = ctx_stack[0:bs] * head_masks[0]
        for hd in range(1, num_heads):
            ctx = ctx + ctx_stack[hd * bs:(hd + 1) * bs] * head_masks[hd]

        attn = jnp.dot(ctx.astype(bf16), wo_ref[li],
                       preferred_element_type=f32) + vecs[base + R_BO]

        h1 = _masked_layernorm(attn + xin, vecs[base + R_LN1G], vecs[base + R_LN1B],
                               hmask, inv_h)

        # feed-forward
        ff = jnp.dot(h1.astype(bf16), wi_ref[li],
                     preferred_element_type=f32) + vecs[base + R_BI]
        ff = _gelu(ff)
        ff = jnp.dot(ff.astype(bf16), wo2_ref[li],
                     preferred_element_type=f32) + vecs[base + R_BO2]

        h = _masked_layernorm(ff + h1, vecs[base + R_LN2G], vecs[base + R_LN2B],
                              hmask, inv_h)

    # ---- outputs: full hidden state + per-position classifier logits ---------
    # CLS-row extraction and un-padding happen in the wrapper; epilogue stores
    # stay fully lane/sublane-dense with no in-kernel gathers or tiny-M matmuls.
    hid_ref[...] = h
    logits_ref[...] = (jnp.dot(h.astype(bf16), wc_ref[...],
                               preferred_element_type=f32) + vecs[ROW_CLS_B])


# ------------------------------ pallas_call wrapper --------------------------
def _full(shape):
    nd = len(shape)
    return pl.BlockSpec(shape, lambda i, _nd=nd: (0,) * _nd)


def bert_for_sequence_classification(packed, input_ids, attention_mask=None,
                                     position_ids=None):
    B, S = input_ids.shape
    if position_ids is None:
        position_ids = jnp.broadcast_to(jnp.arange(S, dtype=jnp.int32)[None, :], (B, S))
    if attention_mask is None:
        attention_mask = jnp.ones((B, S), dtype=jnp.float32)
    mask_flat = attention_mask.astype(jnp.float32).reshape(1, B * S)

    # Embedding gathers are plain-JAX glue; tables are pre-padded to HP lanes.
    # TODO(synk): token-type (segment) embeddings omitted; reference
    # BertEmbeddings here only takes (input_ids, position_ids).
    word = jnp.take(packed["word_emb"], input_ids, axis=0)          # (B, S, HP)
    pos = jnp.take(packed["pos_emb"], position_ids, axis=0)         # (B, S, HP)
    x = (word + pos).reshape(B * S, HP)

    inputs = (x, mask_flat, packed["vecs"],
              packed["wqkv"], packed["wo"], packed["wi"], packed["wo2"], packed["wc"])

    kernel = functools.partial(
        bert_fused_kernel, batch=B, seq=S, hidden=HIDDEN,
        num_heads=NUM_HEADS, head_dim=HEAD_DIM, num_layers=NUM_LAYERS)

    hid_pad, logits_pad = pl.pallas_call(
        kernel,
        out_shape=(jax.ShapeDtypeStruct((B * S, HP), jnp.float32),
                   jax.ShapeDtypeStruct((B * S, LP), jnp.float32)),
        grid=(1,),
        in_specs=[_full(a.shape) for a in inputs],
        out_specs=(_full((B * S, HP)), _full((B * S, LP))),
        compiler_params=pltpu.CompilerParams(dimension_semantics=("arbitrary",)),
    )(*inputs)

    pooled = hid_pad.reshape(B, S, HP)[:, 0, :HIDDEN]          # raw CLS hidden
    logits = logits_pad.reshape(B, S, LP)[:, 0, :NUM_LABELS]   # classifier(CLS)
    return logits, pooled


# ------------------------------ parameter init / packing ---------------------
def init_params(key):
    def nrm(key, shape, scale=0.02):
        return scale * jax.random.normal(key, shape, dtype=jnp.float32)

    keys = jax.random.split(key, 4 + NUM_LAYERS)
    params = {
        "word_emb": nrm(keys[0], (VOCAB_SIZE, HIDDEN)),
        "pos_emb": nrm(keys[1], (MAX_POS, HIDDEN)),
        "emb_ln_g": jnp.ones((HIDDEN,), jnp.float32),
        "emb_ln_b": jnp.zeros((HIDDEN,), jnp.float32),
        "cls_w": nrm(keys[2], (HIDDEN, NUM_LABELS)),
        "cls_b": jnp.zeros((NUM_LABELS,), jnp.float32),
        "layers": [],
    }
    for li in range(NUM_LAYERS):
        lk = jax.random.split(keys[4 + li], 8)
        params["layers"].append({
            "wq": nrm(lk[0], (HIDDEN, HIDDEN)), "bq": jnp.zeros((HIDDEN,), jnp.float32),
            "wk": nrm(lk[1], (HIDDEN, HIDDEN)), "bk": jnp.zeros((HIDDEN,), jnp.float32),
            "wv": nrm(lk[2], (HIDDEN, HIDDEN)), "bv": jnp.zeros((HIDDEN,), jnp.float32),
            "wo": nrm(lk[3], (HIDDEN, HIDDEN)), "bo": jnp.zeros((HIDDEN,), jnp.float32),
            "ln1_g": jnp.ones((HIDDEN,), jnp.float32),
            "ln1_b": jnp.zeros((HIDDEN,), jnp.float32),
            "wi": nrm(lk[4], (HIDDEN, INTERMEDIATE)),
            "bi": jnp.zeros((INTERMEDIATE,), jnp.float32),
            "wo2": nrm(lk[5], (INTERMEDIATE, HIDDEN)),
            "bo2": jnp.zeros((HIDDEN,), jnp.float32),
            "ln2_g": jnp.ones((HIDDEN,), jnp.float32),
            "ln2_b": jnp.zeros((HIDDEN,), jnp.float32),
        })
    return params


def _pad_to(x, shape):
    out = jnp.zeros(shape, x.dtype)
    return out.at[tuple(slice(0, s) for s in x.shape)].set(x)


def pack_params(p):
    """Zero-pad hidden 64->128 lanes, fuse QKV, fold attention scale, stack layers,
    and pack every small bias/LayerNorm vector into one (rows, 128) f32 slab."""
    scale = 1.0 / math.sqrt(HEAD_DIM)
    bf16 = jnp.bfloat16

    vec_rows = [
        _pad_to(p["emb_ln_g"], (HP,)),        # ROW_EMB_G
        _pad_to(p["emb_ln_b"], (HP,)),        # ROW_EMB_B
        _pad_to(p["cls_b"], (LP,)),           # ROW_CLS_B
    ]
    wqkv, wo, wi, wo2 = [], [], [], []
    for lp in p["layers"]:
        wq = _pad_to(lp["wq"] * scale, (HP, HP))
        wk = _pad_to(lp["wk"], (HP, HP))
        wv = _pad_to(lp["wv"], (HP, HP))
        wqkv.append(jnp.concatenate([wq, wk, wv], axis=1))
        wo.append(_pad_to(lp["wo"], (HP, HP)))
        wi.append(_pad_to(lp["wi"], (HP, INTERMEDIATE)))
        wo2.append(_pad_to(lp["wo2"], (INTERMEDIATE, HP)))
        vec_rows += [
            _pad_to(lp["bq"] * scale, (HP,)),     # R_BQ
            _pad_to(lp["bk"], (HP,)),             # R_BK
            _pad_to(lp["bv"], (HP,)),             # R_BV
            _pad_to(lp["bo"], (HP,)),             # R_BO
            _pad_to(lp["ln1_g"], (HP,)),          # R_LN1G
            _pad_to(lp["ln1_b"], (HP,)),          # R_LN1B
            _pad_to(lp["bi"], (INTERMEDIATE,)),   # R_BI
            _pad_to(lp["bo2"], (HP,)),            # R_BO2
            _pad_to(lp["ln2_g"], (HP,)),          # R_LN2G
            _pad_to(lp["ln2_b"], (HP,)),          # R_LN2B
        ]
    vecs = jnp.stack(vec_rows).astype(jnp.float32)
    pad_rows = (-vecs.shape[0]) % 8
    if pad_rows:
        vecs = jnp.concatenate([vecs, jnp.zeros((pad_rows, HP), jnp.float32)], axis=0)

    return {
        "word_emb": _pad_to(p["word_emb"], (VOCAB_SIZE, HP)),
        "pos_emb": _pad_to(p["pos_emb"], (MAX_POS, HP)),
        "vecs": vecs,
        "wqkv": jnp.stack(wqkv).astype(bf16),
        "wo": jnp.stack(wo).astype(bf16),
        "wi": jnp.stack(wi).astype(bf16),
        "wo2": jnp.stack(wo2).astype(bf16),
        "wc": _pad_to(p["cls_w"], (HP, LP)).astype(bf16),
    }


# ---------------------------------- main -------------------------------------
if __name__ == "__main__":
    key = jax.random.PRNGKey(0)
    pkey, ikey = jax.random.split(key)
    params = init_params(pkey)
    packed = pack_params(params)

    input_ids = jax.random.randint(ikey, (BATCH, SEQ), 0, VOCAB_SIZE, dtype=jnp.int32)
    attention_mask = jnp.ones((BATCH, SEQ), dtype=jnp.float32)

    fwd = jax.jit(bert_for_sequence_classification)
    logits, pooled = fwd(packed, input_ids, attention_mask)
    logits = jax.block_until_ready(logits)
    pooled = jax.block_until_ready(pooled)

    assert logits.shape == (BATCH, NUM_LABELS)
    assert pooled.shape == (BATCH, HIDDEN)
    assert bool(jnp.all(jnp.isfinite(logits)))
    print("KERNEL_OK")
</pallas_src>

<mosaic_0001>
module attributes {stable_mosaic.version = 11 : i64} {
  func.func @bert_fused_kernel(%arg0: i32, %arg1: memref<32x128xf32, #tpu.memory_space<vmem>>, %arg2: memref<1x32xf32, #tpu.memory_space<vmem>>, %arg3: memref<24x128xf32, #tpu.memory_space<vmem>>, %arg4: memref<2x128x384xbf16, #tpu.memory_space<vmem>>, %arg5: memref<2x128x128xbf16, #tpu.memory_space<vmem>>, %arg6: memref<2x128x128xbf16, #tpu.memory_space<vmem>>, %arg7: memref<2x128x128xbf16, #tpu.memory_space<vmem>>, %arg8: memref<128x128xbf16, #tpu.memory_space<vmem>>, %arg9: memref<32x128xf32, #tpu.memory_space<vmem>>, %arg10: memref<32x128xf32, #tpu.memory_space<vmem>>) attributes {dimension_semantics = [#tpu.dimension_semantics<arbitrary>], iteration_bounds = array<i64: 1>, scalar_prefetch = 0 : i64, scratch_operands = 0 : i64, tpu.core_type = #tpu.core_type<tc>, window_params = [{pipeline_mode = #tpu.pipeline_mode<synchronous>, transform_indices = @transform_0, window_bounds = array<i64: 32, 128>}, {pipeline_mode = #tpu.pipeline_mode<synchronous>, transform_indices = @transform_1, window_bounds = array<i64: 1, 32>}, {pipeline_mode = #tpu.pipeline_mode<synchronous>, transform_indices = @transform_2, window_bounds = array<i64: 24, 128>}, {pipeline_mode = #tpu.pipeline_mode<synchronous>, transform_indices = @transform_3, window_bounds = array<i64: 2, 128, 384>}, {pipeline_mode = #tpu.pipeline_mode<synchronous>, transform_indices = @transform_4, window_bounds = array<i64: 2, 128, 128>}, {pipeline_mode = #tpu.pipeline_mode<synchronous>, transform_indices = @transform_5, window_bounds = array<i64: 2, 128, 128>}, {pipeline_mode = #tpu.pipeline_mode<synchronous>, transform_indices = @transform_6, window_bounds = array<i64: 2, 128, 128>}, {pipeline_mode = #tpu.pipeline_mode<synchronous>, transform_indices = @transform_7, window_bounds = array<i64: 128, 128>}, {pipeline_mode = #tpu.pipeline_mode<synchronous>, transform_indices = @transform_8, window_bounds = array<i64: 32, 128>}, {pipeline_mode = #tpu.pipeline_mode<synchronous>, transform_indices = @transform_9, window_bounds = array<i64: 32, 128>}]} {
    %c0 = arith.constant 0 : index
    %c0_0 = arith.constant 0 : index
    %0 = vector.load %arg3[%c0, %c0_0] : memref<24x128xf32, #tpu.memory_space<vmem>>, vector<24x128xf32>
    %1 = tpu.iota {dimensions = array<i32: 1>} : vector<1x128xi32>
    %c64_i32 = arith.constant 64 : i32
    %2 = vector.broadcast %c64_i32 : i32 to vector<1x128xi32>
    %3 = arith.cmpi slt, %1, %2 : vector<1x128xi32>
    %4 = arith.extui %3 : vector<1x128xi1> to vector<1x128xi32>
    %5 = arith.sitofp %4 : vector<1x128xi32> to vector<1x128xf32>
    %c0_i32 = arith.constant 0 : i32
    %6 = vector.broadcast %c0_i32 : i32 to vector<1x128xi32>
    %7 = arith.cmpi sge, %1, %6 : vector<1x128xi32>
    %c32_i32 = arith.constant 32 : i32
    %8 = vector.broadcast %c32_i32 : i32 to vector<1x128xi32>
    %9 = arith.cmpi slt, %1, %8 : vector<1x128xi32>
    %10 = arith.andi %7, %9 : vector<1x128xi1>
    %11 = arith.extui %10 : vector<1x128xi1> to vector<1x128xi32>
    %12 = arith.sitofp %11 : vector<1x128xi32> to vector<1x128xf32>
    %c32_i32_1 = arith.constant 32 : i32
    %13 = vector.broadcast %c32_i32_1 : i32 to vector<1x128xi32>
    %14 = arith.cmpi sge, %1, %13 : vector<1x128xi32>
    %c64_i32_2 = arith.constant 64 : i32
    %15 = vector.broadcast %c64_i32_2 : i32 to vector<1x128xi32>
    %16 = arith.cmpi slt, %1, %15 : vector<1x128xi32>
    %17 = arith.andi %14, %16 : vector<1x128xi1>
    %18 = arith.extui %17 : vector<1x128xi1> to vector<1x128xi32>
    %19 = arith.sitofp %18 : vector<1x128xi32> to vector<1x128xf32>
    %20 = tpu.iota {dimensions = array<i32: 0>} : vector<32x32xi32>
    %21 = tpu.iota {dimensions = array<i32: 1>} : vector<32x32xi32>
    %c0_i32_3 = arith.constant 0 : i32
    %22 = vector.broadcast %c0_i32_3 : i32 to vector<32x32xi32>
    %23 = arith.cmpi sge, %20, %22 : vector<32x32xi32>
    %c16_i32 = arith.constant 16 : i32
    %24 = vector.broadcast %c16_i32 : i32 to vector<32x32xi32>
    %25 = arith.cmpi slt, %20, %24 : vector<32x32xi32>
    %26 = arith.andi %23, %25 : vector<32x32xi1>
    %c0_i32_4 = arith.constant 0 : i32
    %27 = vector.broadcast %c0_i32_4 : i32 to vector<32x32xi32>
    %28 = arith.cmpi sge, %21, %27 : vector<32x32xi32>
    %29 = arith.andi %26, %28 : vector<32x32xi1>
    %c16_i32_5 = arith.constant 16 : i32
    %30 = vector.broadcast %c16_i32_5 : i32 to vector<32x32xi32>
    %31 = arith.cmpi slt, %21, %30 : vector<32x32xi32>
    %32 = arith.andi %29, %31 : vector<32x32xi1>
    %c16_i32_6 = arith.constant 16 : i32
    %33 = vector.broadcast %c16_i32_6 : i32 to vector<32x32xi32>
    %34 = arith.cmpi sge, %20, %33 : vector<32x32xi32>
    %c32_i32_7 = arith.constant 32 : i32
    %35 = vector.broadcast %c32_i32_7 : i32 to vector<32x32xi32>
    %36 = arith.cmpi slt, %20, %35 : vector<32x32xi32>
    %37 = arith.andi %34, %36 : vector<32x32xi1>
    %c16_i32_8 = arith.constant 16 : i32
    %38 = vector.broadcast %c16_i32_8 : i32 to vector<32x32xi32>
    %39 = arith.cmpi sge, %21, %38 : vector<32x32xi32>
    %40 = arith.andi %37, %39 : vector<32x32xi1>
    %c32_i32_9 = arith.constant 32 : i32
    %41 = vector.broadcast %c32_i32_9 : i32 to vector<32x32xi32>
    %42 = arith.cmpi slt, %21, %41 : vector<32x32xi32>
    %43 = arith.andi %40, %42 : vector<32x32xi1>
    %44 = arith.ori %32, %43 : vector<32x32xi1>
    %c0_10 = arith.constant 0 : index
    %c0_11 = arith.constant 0 : index
    %45 = vector.load %arg2[%c0_10, %c0_11] : memref<1x32xf32, #tpu.memory_space<vmem>>, vector<1x32xf32>
    %cst = arith.constant 1.000000e+00 : f32
    %46 = vector.broadcast %cst : f32 to vector<1x32xf32>
    %47 = arith.subf %46, %45 : vector<1x32xf32>
    %cst_12 = arith.constant -1.000000e+04 : f32
    %48 = vector.broadcast %cst_12 : f32 to vector<1x32xf32>
    %49 = arith.mulf %47, %48 : vector<1x32xf32>
    %cst_13 = arith.constant -3.000000e+04 : f32
    %50 = vector.shape_cast %49 : vector<1x32xf32> to vector<1x32xf32>
    %51 = vector.broadcast %50 : vector<1x32xf32> to vector<32x32xf32>
    %52 = vector.broadcast %cst_13 : f32 to vector<32x32xf32>
    %53 = arith.select %44, %51, %52 : vector<32x32xi1>, vector<32x32xf32>
    %54 = tpu.concatenate %53, %53 in 0 : vector<32x32xf32>, vector<32x32xf32> -> vector<64x32xf32>
    %c0_14 = arith.constant 0 : index
    %c0_15 = arith.constant 0 : index
    %55 = vector.load %arg1[%c0_14, %c0_15] : memref<32x128xf32, #tpu.memory_space<vmem>>, vector<32x128xf32>
    %56 = vector.extract_strided_slice %0 {offsets = [0, 0], sizes = [1, 128], strides = [1, 1]} : vector<24x128xf32> to vector<1x128xf32>
    %57 = vector.shape_cast %56 : vector<1x128xf32> to vector<128xf32>
    %58 = vector.extract_strided_slice %0 {offsets = [1, 0], sizes = [1, 128], strides = [1, 1]} : vector<24x128xf32> to vector<1x128xf32>
    %59 = vector.shape_cast %58 : vector<1x128xf32> to vector<128xf32>
    %cst_16 = arith.constant dense<0.000000e+00> : vector<32xf32>
    %60 = vector.multi_reduction <add>, %55, %cst_16 [1] : vector<32x128xf32> to vector<32xf32>
    %61 = vector.shape_cast %60 : vector<32xf32> to vector<32x1xf32>
    %cst_17 = arith.constant 1.562500e-02 : f32
    %62 = vector.broadcast %cst_17 : f32 to vector<32x1xf32>
    %63 = arith.mulf %61, %62 : vector<32x1xf32>
    %64 = vector.broadcast %63 : vector<32x1xf32> to vector<32x128xf32>
    %65 = arith.subf %55, %64 : vector<32x128xf32>
    %66 = vector.broadcast %5 : vector<1x128xf32> to vector<32x128xf32>
    %67 = arith.mulf %65, %66 : vector<32x128xf32>
    %68 = arith.mulf %67, %67 : vector<32x128xf32>
    %cst_18 = arith.constant dense<0.000000e+00> : vector<32xf32>
    %69 = vector.multi_reduction <add>, %68, %cst_18 [1] : vector<32x128xf32> to vector<32xf32>
    %70 = vector.shape_cast %69 : vector<32xf32> to vector<32x1xf32>
    %cst_19 = arith.constant 1.562500e-02 : f32
    %71 = vector.broadcast %cst_19 : f32 to vector<32x1xf32>
    %72 = arith.mulf %70, %71 : vector<32x1xf32>
    %cst_20 = arith.constant 9.99999996E-13 : f32
    %73 = vector.broadcast %cst_20 : f32 to vector<32x1xf32>
    %74 = arith.addf %72, %73 : vector<32x1xf32>
    %75 = math.rsqrt %74 : vector<32x1xf32>
    %76 = vector.broadcast %75 : vector<32x1xf32> to vector<32x128xf32>
    %77 = arith.mulf %67, %76 : vector<32x128xf32>
    %78 = vector.shape_cast %57 : vector<128xf32> to vector<1x128xf32>
    %79 = vector.broadcast %78 : vector<1x128xf32> to vector<32x128xf32>
    %80 = arith.mulf %77, %79 : vector<32x128xf32>
    %81 = vector.shape_cast %59 : vector<128xf32> to vector<1x128xf32>
    %82 = vector.broadcast %81 : vector<1x128xf32> to vector<32x128xf32>
    %83 = arith.addf %80, %82 : vector<32x128xf32>
    %84 = arith.truncf %83 : vector<32x128xf32> to vector<32x128xbf16>
    %c0_21 = arith.constant 0 : index
    %c0_22 = arith.constant 0 : index
    %c0_23 = arith.constant 0 : index
    %85 = vector.load %arg4[%c0_21, %c0_22, %c0_23] : memref<2x128x384xbf16, #tpu.memory_space<vmem>>, vector<1x128x384xbf16>
    %86 = vector.shape_cast %85 : vector<1x128x384xbf16> to vector<128x384xbf16>
    %cst_24 = arith.constant dense<0.000000e+00> : vector<32x384xf32>
    %87 = tpu.matmul %84, %86, %cst_24 {dimension_numbers = #tpu.dot_dimension_numbers<[1], [0], [0], [1], [0, 0, 1, 1], [], []>} : vector<32x128xbf16>, vector<128x384xbf16>, vector<32x384xf32> -> vector<32x384xf32>
    %88 = vector.extract_strided_slice %87 {offsets = [0, 0], sizes = [32, 128], strides = [1, 1]} : vector<32x384xf32> to vector<32x128xf32>
    %89 = vector.extract_strided_slice %0 {offsets = [3, 0], sizes = [1, 128], strides = [1, 1]} : vector<24x128xf32> to vector<1x128xf32>
    %90 = vector.shape_cast %89 : vector<1x128xf32> to vector<128xf32>
    %91 = vector.shape_cast %90 : vector<128xf32> to vector<1x128xf32>
    %92 = vector.broadcast %91 : vector<1x128xf32> to vector<32x128xf32>
    %93 = arith.addf %88, %92 : vector<32x128xf32>
    %94 = vector.extract_strided_slice %87 {offsets = [0, 128], sizes = [32, 128], strides = [1, 1]} : vector<32x384xf32> to vector<32x128xf32>
    %95 = vector.extract_strided_slice %0 {offsets = [4, 0], sizes = [1, 128], strides = [1, 1]} : vector<24x128xf32> to vector<1x128xf32>
    %96 = vector.shape_cast %95 : vector<1x128xf32> to vector<128xf32>
    %97 = vector.shape_cast %96 : vector<128xf32> to vector<1x128xf32>
    %98 = vector.broadcast %97 : vector<1x128xf32> to vector<32x128xf32>
    %99 = arith.addf %94, %98 : vector<32x128xf32>
    %100 = arith.truncf %99 : vector<32x128xf32> to vector<32x128xbf16>
    %101 = vector.extract_strided_slice %87 {offsets = [0, 256], sizes = [32, 128], strides = [1, 1]} : vector<32x384xf32> to vector<32x128xf32>
    %102 = vector.extract_strided_slice %0 {offsets = [5, 0], sizes = [1, 128], strides = [1, 1]} : vector<24x128xf32> to vector<1x128xf32>
    %103 = vector.shape_cast %102 : vector<1x128xf32> to vector<128xf32>
    %104 = vector.shape_cast %103 : vector<128xf32> to vector<1x128xf32>
    %105 = vector.broadcast %104 : vector<1x128xf32> to vector<32x128xf32>
    %106 = arith.addf %101, %105 : vector<32x128xf32>
    %107 = arith.truncf %106 : vector<32x128xf32> to vector<32x128xbf16>
    %108 = vector.broadcast %12 : vector<1x128xf32> to vector<32x128xf32>
    %109 = arith.mulf %93, %108 : vector<32x128xf32>
    %110 = vector.broadcast %19 : vector<1x128xf32> to vector<32x128xf32>
    %111 = arith.mulf %93, %110 : vector<32x128xf32>
    %112 = tpu.concatenate %109, %111 in 0 : vector<32x128xf32>, vector<32x128xf32> -> vector<64x128xf32>
    %113 = arith.truncf %112 : vector<64x128xf32> to vector<64x128xbf16>
    %cst_25 = arith.constant dense<0.000000e+00> : vector<64x32xf32>
    %114 = tpu.matmul %113, %100, %cst_25 {dimension_numbers = #tpu.dot_dimension_numbers<[1], [1], [0], [0], [0, 0, 1, 0], [], []>} : vector<64x128xbf16>, vector<32x128xbf16>, vector<64x32xf32> -> vector<64x32xf32>
    %115 = arith.addf %114, %54 : vector<64x32xf32>
    %cst_26 = arith.constant dense<0xFF800000> : vector<64xf32>
    %116 = vector.multi_reduction <maximumf>, %115, %cst_26 [1] : vector<64x32xf32> to vector<64xf32>
    %117 = vector.shape_cast %116 : vector<64xf32> to vector<64x1xf32>
    %118 = vector.broadcast %117 : vector<64x1xf32> to vector<64x32xf32>
    %119 = arith.subf %115, %118 : vector<64x32xf32>
    %120 = math.exp %119 : vector<64x32xf32>
    %cst_27 = arith.constant dense<0.000000e+00> : vector<64xf32>
    %121 = vector.multi_reduction <add>, %120, %cst_27 [1] : vector<64x32xf32> to vector<64xf32>
    %122 = vector.shape_cast %121 : vector<64xf32> to vector<64x1xf32>
    %123 = tpu.reciprocal %122 {approx = true} : vector<64x1xf32> -> vector<64x1xf32>
    %124 = vector.broadcast %123 : vector<64x1xf32> to vector<64x32xf32>
    %125 = arith.mulf %120, %124 : vector<64x32xf32>
    %126 = arith.truncf %125 : vector<64x32xf32> to vector<64x32xbf16>
    %cst_28 = arith.constant dense<0.000000e+00> : vector<64x128xf32>
    %127 = tpu.matmul %126, %107, %cst_28 {dimension_numbers = #tpu.dot_dimension_numbers<[1], [0], [0], [1], [0, 0, 1, 1], [], []>} : vector<64x32xbf16>, vector<32x128xbf16>, vector<64x128xf32> -> vector<64x128xf32>
    %128 = vector.extract_strided_slice %127 {offsets = [0, 0], sizes = [32, 128], strides = [1, 1]} : vector<64x128xf32> to vector<32x128xf32>
    %129 = vector.broadcast %12 : vector<1x128xf32> to vector<32x128xf32>
    %130 = arith.mulf %128, %129 : vector<32x128xf32>
    %131 = vector.extract_strided_slice %127 {offsets = [32, 0], sizes = [32, 128], strides = [1, 1]} : vector<64x128xf32> to vector<32x128xf32>
    %132 = vector.broadcast %19 : vector<1x128xf32> to vector<32x128xf32>
    %133 = arith.mulf %131, %132 : vector<32x128xf32>
    %134 = arith.addf %130, %133 : vector<32x128xf32>
    %135 = arith.truncf %134 : vector<32x128xf32> to vector<32x128xbf16>
    %c0_29 = arith.constant 0 : index
    %c0_30 = arith.constant 0 : index
    %c0_31 = arith.constant 0 : index
    %136 = vector.load %arg5[%c0_29, %c0_30, %c0_31] : memref<2x128x128xbf16, #tpu.memory_space<vmem>>, vector<1x128x128xbf16>
    %137 = vector.shape_cast %136 : vector<1x128x128xbf16> to vector<128x128xbf16>
    %cst_32 = arith.constant dense<0.000000e+00> : vector<32x128xf32>
    %138 = tpu.matmul %135, %137, %cst_32 {dimension_numbers = #tpu.dot_dimension_numbers<[1], [0], [0], [1], [0, 0, 1, 1], [], []>} : vector<32x128xbf16>, vector<128x128xbf16>, vector<32x128xf32> -> vector<32x128xf32>
    %139 = vector.extract_strided_slice %0 {offsets = [6, 0], sizes = [1, 128], strides = [1, 1]} : vector<24x128xf32> to vector<1x128xf32>
    %140 = vector.shape_cast %139 : vector<1x128xf32> to vector<128xf32>
    %141 = vector.shape_cast %140 : vector<128xf32> to vector<1x128xf32>
    %142 = vector.broadcast %141 : vector<1x128xf32> to vector<32x128xf32>
    %143 = arith.addf %138, %142 : vector<32x128xf32>
    %144 = arith.addf %143, %83 : vector<32x128xf32>
    %145 = vector.extract_strided_slice %0 {offsets = [7, 0], sizes = [1, 128], strides = [1, 1]} : vector<24x128xf32> to vector<1x128xf32>
    %146 = vector.shape_cast %145 : vector<1x128xf32> to vector<128xf32>
    %147 = vector.extract_strided_slice %0 {offsets = [8, 0], sizes = [1, 128], strides = [1, 1]} : vector<24x128xf32> to vector<1x128xf32>
    %148 = vector.shape_cast %147 : vector<1x128xf32> to vector<128xf32>
    %cst_33 = arith.constant dense<0.000000e+00> : vector<32xf32>
    %149 = vector.multi_reduction <add>, %144, %cst_33 [1] : vector<32x128xf32> to vector<32xf32>
    %150 = vector.shape_cast %149 : vector<32xf32> to vector<32x1xf32>
    %cst_34 = arith.constant 1.562500e-02 : f32
    %151 = vector.broadcast %cst_34 : f32 to vector<32x1xf32>
    %152 = arith.mulf %150, %151 : vector<32x1xf32>
    %153 = vector.broadcast %152 : vector<32x1xf32> to vector<32x128xf32>
    %154 = arith.subf %144, %153 : vector<32x128xf32>
    %155 = vector.broadcast %5 : vector<1x128xf32> to vector<32x128xf32>
    %156 = arith.mulf %154, %155 : vector<32x128xf32>
    %157 = arith.mulf %156, %156 : vector<32x128xf32>
    %cst_35 = arith.constant dense<0.000000e+00> : vector<32xf32>
    %158 = vector.multi_reduction <add>, %157, %cst_35 [1] : vector<32x128xf32> to vector<32xf32>
    %159 = vector.shape_cast %158 : vector<32xf32> to vector<32x1xf32>
    %cst_36 = arith.constant 1.562500e-02 : f32
    %160 = vector.broadcast %cst_36 : f32 to vector<32x1xf32>
    %161 = arith.mulf %159, %160 : vector<32x1xf32>
    %cst_37 = arith.constant 9.99999996E-13 : f32
    %162 = vector.broadcast %cst_37 : f32 to vector<32x1xf32>
    %163 = arith.addf %161, %162 : vector<32x1xf32>
    %164 = math.rsqrt %163 : vector<32x1xf32>
    %165 = vector.broadcast %164 : vector<32x1xf32> to vector<32x128xf32>
    %166 = arith.mulf %156, %165 : vector<32x128xf32>
    %167 = vector.shape_cast %146 : vector<128xf32> to vector<1x128xf32>
    %168 = vector.broadcast %167 : vector<1x128xf32> to vector<32x128xf32>
    %169 = arith.mulf %166, %168 : vector<32x128xf32>
    %170 = vector.shape_cast %148 : vector<128xf32> to vector<1x128xf32>
    %171 = vector.broadcast %170 : vector<1x128xf32> to vector<32x128xf32>
    %172 = arith.addf %169, %171 : vector<32x128xf32>
    %173 = arith.truncf %172 : vector<32x128xf32> to vector<32x128xbf16>
    %c0_38 = arith.constant 0 : index
    %c0_39 = arith.constant 0 : index
    %c0_40 = arith.constant 0 : index
    %174 = vector.load %arg6[%c0_38, %c0_39, %c0_40] : memref<2x128x128xbf16, #tpu.memory_space<vmem>>, vector<1x128x128xbf16>
    %175 = vector.shape_cast %174 : vector<1x128x128xbf16> to vector<128x128xbf16>
    %cst_41 = arith.constant dense<0.000000e+00> : vector<32x128xf32>
    %176 = tpu.matmul %173, %175, %cst_41 {dimension_numbers = #tpu.dot_dimension_numbers<[1], [0], [0], [1], [0, 0, 1, 1], [], []>} : vector<32x128xbf16>, vector<128x128xbf16>, vector<32x128xf32> -> vector<32x128xf32>
    %177 = vector.extract_strided_slice %0 {offsets = [9, 0], sizes = [1, 128], strides = [1, 1]} : vector<24x128xf32> to vector<1x128xf32>
    %178 = vector.shape_cast %177 : vector<1x128xf32> to vector<128xf32>
    %179 = vector.shape_cast %178 : vector<128xf32> to vector<1x128xf32>
    %180 = vector.broadcast %179 : vector<1x128xf32> to vector<32x128xf32>
    %181 = arith.addf %176, %180 : vector<32x128xf32>
    %cst_42 = arith.constant 5.000000e-01 : f32
    %182 = vector.broadcast %cst_42 : f32 to vector<32x128xf32>
    %183 = arith.mulf %182, %181 : vector<32x128xf32>
    %cst_43 = arith.constant 4.471500e-02 : f32
    %184 = vector.broadcast %cst_43 : f32 to vector<32x128xf32>
    %185 = arith.mulf %184, %181 : vector<32x128xf32>
    %186 = arith.mulf %185, %181 : vector<32x128xf32>
    %187 = arith.mulf %186, %181 : vector<32x128xf32>
    %188 = arith.addf %181, %187 : vector<32x128xf32>
    %cst_44 = arith.constant 0.797884583 : f32
    %189 = vector.broadcast %cst_44 : f32 to vector<32x128xf32>
    %190 = arith.mulf %189, %188 : vector<32x128xf32>
    %191 = math.tanh %190 : vector<32x128xf32>
    %cst_45 = arith.constant 1.000000e+00 : f32
    %192 = vector.broadcast %cst_45 : f32 to vector<32x128xf32>
    %193 = arith.addf %192, %191 : vector<32x128xf32>
    %194 = arith.mulf %183, %193 : vector<32x128xf32>
    %195 = arith.truncf %194 : vector<32x128xf32> to vector<32x128xbf16>
    %c0_46 = arith.constant 0 : index
    %c0_47 = arith.constant 0 : index
    %c0_48 = arith.constant 0 : index
    %196 = vector.load %arg7[%c0_46, %c0_47, %c0_48] : memref<2x128x128xbf16, #tpu.memory_space<vmem>>, vector<1x128x128xbf16>
    %197 = vector.shape_cast %196 : vector<1x128x128xbf16> to vector<128x128xbf16>
    %cst_49 = arith.constant dense<0.000000e+00> : vector<32x128xf32>
    %198 = tpu.matmul %195, %197, %cst_49 {dimension_numbers = #tpu.dot_dimension_numbers<[1], [0], [0], [1], [0, 0, 1, 1], [], []>} : vector<32x128xbf16>, vector<128x128xbf16>, vector<32x128xf32> -> vector<32x128xf32>
    %199 = vector.extract_strided_slice %0 {offsets = [10, 0], sizes = [1, 128], strides = [1, 1]} : vector<24x128xf32> to vector<1x128xf32>
    %200 = vector.shape_cast %199 : vector<1x128xf32> to vector<128xf32>
    %201 = vector.shape_cast %200 : vector<128xf32> to vector<1x128xf32>
    %202 = vector.broadcast %201 : vector<1x128xf32> to vector<32x128xf32>
    %203 = arith.addf %198, %202 : vector<32x128xf32>
    %204 = arith.addf %203, %172 : vector<32x128xf32>
    %205 = vector.extract_strided_slice %0 {offsets = [11, 0], sizes = [1, 128], strides = [1, 1]} : vector<24x128xf32> to vector<1x128xf32>
    %206 = vector.shape_cast %205 : vector<1x128xf32> to vector<128xf32>
    %207 = vector.extract_strided_slice %0 {offsets = [12, 0], sizes = [1, 128], strides = [1, 1]} : vector<24x128xf32> to vector<1x128xf32>
    %208 = vector.shape_cast %207 : vector<1x128xf32> to vector<128xf32>
    %cst_50 = arith.constant dense<0.000000e+00> : vector<32xf32>
    %209 = vector.multi_reduction <add>, %204, %cst_50 [1] : vector<32x128xf32> to vector<32xf32>
    %210 = vector.shape_cast %209 : vector<32xf32> to vector<32x1xf32>
    %cst_51 = arith.constant 1.562500e-02 : f32
    %211 = vector.broadcast %cst_51 : f32 to vector<32x1xf32>
    %212 = arith.mulf %210, %211 : vector<32x1xf32>
    %213 = vector.broadcast %212 : vector<32x1xf32> to vector<32x128xf32>
    %214 = arith.subf %204, %213 : vector<32x128xf32>
    %215 = vector.broadcast %5 : vector<1x128xf32> to vector<32x128xf32>
    %216 = arith.mulf %214, %215 : vector<32x128xf32>
    %217 = arith.mulf %216, %216 : vector<32x128xf32>
    %cst_52 = arith.constant dense<0.000000e+00> : vector<32xf32>
    %218 = vector.multi_reduction <add>, %217, %cst_52 [1] : vector<32x128xf32> to vector<32xf32>
    %219 = vector.shape_cast %218 : vector<32xf32> to vector<32x1xf32>
    %cst_53 = arith.constant 1.562500e-02 : f32
    %220 = vector.broadcast %cst_53 : f32 to vector<32x1xf32>
    %221 = arith.mulf %219, %220 : vector<32x1xf32>
    %cst_54 = arith.constant 9.99999996E-13 : f32
    %222 = vector.broadcast %cst_54 : f32 to vector<32x1xf32>
    %223 = arith.addf %221, %222 : vector<32x1xf32>
    %224 = math.rsqrt %223 : vector<32x1xf32>
    %225 = vector.broadcast %224 : vector<32x1xf32> to vector<32x128xf32>
    %226 = arith.mulf %216, %225 : vector<32x128xf32>
    %227 = vector.shape_cast %206 : vector<128xf32> to vector<1x128xf32>
    %228 = vector.broadcast %227 : vector<1x128xf32> to vector<32x128xf32>
    %229 = arith.mulf %226, %228 : vector<32x128xf32>
    %230 = vector.shape_cast %208 : vector<128xf32> to vector<1x128xf32>
    %231 = vector.broadcast %230 : vector<1x128xf32> to vector<32x128xf32>
    %232 = arith.addf %229, %231 : vector<32x128xf32>
    %233 = arith.truncf %232 : vector<32x128xf32> to vector<32x128xbf16>
    %c1 = arith.constant 1 : index
    %c0_55 = arith.constant 0 : index
    %c0_56 = arith.constant 0 : index
    %234 = vector.load %arg4[%c1, %c0_55, %c0_56] : memref<2x128x384xbf16, #tpu.memory_space<vmem>>, vector<1x128x384xbf16>
    %235 = vector.shape_cast %234 : vector<1x128x384xbf16> to vector<128x384xbf16>
    %cst_57 = arith.constant dense<0.000000e+00> : vector<32x384xf32>
    %236 = tpu.matmul %233, %235, %cst_57 {dimension_numbers = #tpu.dot_dimension_numbers<[1], [0], [0], [1], [0, 0, 1, 1], [], []>} : vector<32x128xbf16>, vector<128x384xbf16>, vector<32x384xf32> -> vector<32x384xf32>
    %237 = vector.extract_strided_slice %236 {offsets = [0, 0], sizes = [32, 128], strides = [1, 1]} : vector<32x384xf32> to vector<32x128xf32>
    %238 = vector.extract_strided_slice %0 {offsets = [13, 0], sizes = [1, 128], strides = [1, 1]} : vector<24x128xf32> to vector<1x128xf32>
    %239 = vector.shape_cast %238 : vector<1x128xf32> to vector<128xf32>
    %240 = vector.shape_cast %239 : vector<128xf32> to vector<1x128xf32>
    %241 = vector.broadcast %240 : vector<1x128xf32> to vector<32x128xf32>
    %242 = arith.addf %237, %241 : vector<32x128xf32>
    %243 = vector.extract_strided_slice %236 {offsets = [0, 128], sizes = [32, 128], strides = [1, 1]} : vector<32x384xf32> to vector<32x128xf32>
    %244 = vector.extract_strided_slice %0 {offsets = [14, 0], sizes = [1, 128], strides = [1, 1]} : vector<24x128xf32> to vector<1x128xf32>
    %245 = vector.shape_cast %244 : vector<1x128xf32> to vector<128xf32>
    %246 = vector.shape_cast %245 : vector<128xf32> to vector<1x128xf32>
    %247 = vector.broadcast %246 : vector<1x128xf32> to vector<32x128xf32>
    %248 = arith.addf %243, %247 : vector<32x128xf32>
    %249 = arith.truncf %248 : vector<32x128xf32> to vector<32x128xbf16>
    %250 = vector.extract_strided_slice %236 {offsets = [0, 256], sizes = [32, 128], strides = [1, 1]} : vector<32x384xf32> to vector<32x128xf32>
    %251 = vector.extract_strided_slice %0 {offsets = [15, 0], sizes = [1, 128], strides = [1, 1]} : vector<24x128xf32> to vector<1x128xf32>
    %252 = vector.shape_cast %251 : vector<1x128xf32> to vector<128xf32>
    %253 = vector.shape_cast %252 : vector<128xf32> to vector<1x128xf32>
    %254 = vector.broadcast %253 : vector<1x128xf32> to vector<32x128xf32>
    %255 = arith.addf %250, %254 : vector<32x128xf32>
    %256 = arith.truncf %255 : vector<32x128xf32> to vector<32x128xbf16>
    %257 = vector.broadcast %12 : vector<1x128xf32> to vector<32x128xf32>
    %258 = arith.mulf %242, %257 : vector<32x128xf32>
    %259 = vector.broadcast %19 : vector<1x128xf32> to vector<32x128xf32>
    %260 = arith.mulf %242, %259 : vector<32x128xf32>
    %261 = tpu.concatenate %258, %260 in 0 : vector<32x128xf32>, vector<32x128xf32> -> vector<64x128xf32>
    %262 = arith.truncf %261 : vector<64x128xf32> to vector<64x128xbf16>
    %cst_58 = arith.constant dense<0.000000e+00> : vector<64x32xf32>
    %263 = tpu.matmul %262, %249, %cst_58 {dimension_numbers = #tpu.dot_dimension_numbers<[1], [1], [0], [0], [0, 0, 1, 0], [], []>} : vector<64x128xbf16>, vector<32x128xbf16>, vector<64x32xf32> -> vector<64x32xf32>
    %264 = arith.addf %263, %54 : vector<64x32xf32>
    %cst_59 = arith.constant dense<0xFF800000> : vector<64xf32>
    %265 = vector.multi_reduction <maximumf>, %264, %cst_59 [1] : vector<64x32xf32> to vector<64xf32>
    %266 = vector.shape_cast %265 : vector<64xf32> to vector<64x1xf32>
    %267 = vector.broadcast %266 : vector<64x1xf32> to vector<64x32xf32>
    %268 = arith.subf %264, %267 : vector<64x32xf32>
    %269 = math.exp %268 : vector<64x32xf32>
    %cst_60 = arith.constant dense<0.000000e+00> : vector<64xf32>
    %270 = vector.multi_reduction <add>, %269, %cst_60 [1] : vector<64x32xf32> to vector<64xf32>
    %271 = vector.shape_cast %270 : vector<64xf32> to vector<64x1xf32>
    %272 = tpu.reciprocal %271 {approx = true} : vector<64x1xf32> -> vector<64x1xf32>
    %273 = vector.broadcast %272 : vector<64x1xf32> to vector<64x32xf32>
    %274 = arith.mulf %269, %273 : vector<64x32xf32>
    %275 = arith.truncf %274 : vector<64x32xf32> to vector<64x32xbf16>
    %cst_61 = arith.constant dense<0.000000e+00> : vector<64x128xf32>
    %276 = tpu.matmul %275, %256, %cst_61 {dimension_numbers = #tpu.dot_dimension_numbers<[1], [0], [0], [1], [0, 0, 1, 1], [], []>} : vector<64x32xbf16>, vector<32x128xbf16>, vector<64x128xf32> -> vector<64x128xf32>
    %277 = vector.extract_strided_slice %276 {offsets = [0, 0], sizes = [32, 128], strides = [1, 1]} : vector<64x128xf32> to vector<32x128xf32>
    %278 = vector.broadcast %12 : vector<1x128xf32> to vector<32x128xf32>
    %279 = arith.mulf %277, %278 : vector<32x128xf32>
    %280 = vector.extract_strided_slice %276 {offsets = [32, 0], sizes = [32, 128], strides = [1, 1]} : vector<64x128xf32> to vector<32x128xf32>
    %281 = vector.broadcast %19 : vector<1x128xf32> to vector<32x128xf32>
    %282 = arith.mulf %280, %281 : vector<32x128xf32>
    %283 = arith.addf %279, %282 : vector<32x128xf32>
    %284 = arith.truncf %283 : vector<32x128xf32> to vector<32x128xbf16>
    %c1_62 = arith.constant 1 : index
    %c0_63 = arith.constant 0 : index
    %c0_64 = arith.constant 0 : index
    %285 = vector.load %arg5[%c1_62, %c0_63, %c0_64] : memref<2x128x128xbf16, #tpu.memory_space<vmem>>, vector<1x128x128xbf16>
    %286 = vector.shape_cast %285 : vector<1x128x128xbf16> to vector<128x128xbf16>
    %cst_65 = arith.constant dense<0.000000e+00> : vector<32x128xf32>
    %287 = tpu.matmul %284, %286, %cst_65 {dimension_numbers = #tpu.dot_dimension_numbers<[1], [0], [0], [1], [0, 0, 1, 1], [], []>} : vector<32x128xbf16>, vector<128x128xbf16>, vector<32x128xf32> -> vector<32x128xf32>
    %288 = vector.extract_strided_slice %0 {offsets = [16, 0], sizes = [1, 128], strides = [1, 1]} : vector<24x128xf32> to vector<1x128xf32>
    %289 = vector.shape_cast %288 : vector<1x128xf32> to vector<128xf32>
    %290 = vector.shape_cast %289 : vector<128xf32> to vector<1x128xf32>
    %291 = vector.broadcast %290 : vector<1x128xf32> to vector<32x128xf32>
    %292 = arith.addf %287, %291 : vector<32x128xf32>
    %293 = arith.addf %292, %232 : vector<32x128xf32>
    %294 = vector.extract_strided_slice %0 {offsets = [17, 0], sizes = [1, 128], strides = [1, 1]} : vector<24x128xf32> to vector<1x128xf32>
    %295 = vector.shape_cast %294 : vector<1x128xf32> to vector<128xf32>
    %296 = vector.extract_strided_slice %0 {offsets = [18, 0], sizes = [1, 128], strides = [1, 1]} : vector<24x128xf32> to vector<1x128xf32>
    %297 = vector.shape_cast %296 : vector<1x128xf32> to vector<128xf32>
    %cst_66 = arith.constant dense<0.000000e+00> : vector<32xf32>
    %298 = vector.multi_reduction <add>, %293, %cst_66 [1] : vector<32x128xf32> to vector<32xf32>
    %299 = vector.shape_cast %298 : vector<32xf32> to vector<32x1xf32>
    %cst_67 = arith.constant 1.562500e-02 : f32
    %300 = vector.broadcast %cst_67 : f32 to vector<32x1xf32>
    %301 = arith.mulf %299, %300 : vector<32x1xf32>
    %302 = vector.broadcast %301 : vector<32x1xf32> to vector<32x128xf32>
    %303 = arith.subf %293, %302 : vector<32x128xf32>
    %304 = vector.broadcast %5 : vector<1x128xf32> to vector<32x128xf32>
    %305 = arith.mulf %303, %304 : vector<32x128xf32>
    %306 = arith.mulf %305, %305 : vector<32x128xf32>
    %cst_68 = arith.constant dense<0.000000e+00> : vector<32xf32>
    %307 = vector.multi_reduction <add>, %306, %cst_68 [1] : vector<32x128xf32> to vector<32xf32>
    %308 = vector.shape_cast %307 : vector<32xf32> to vector<32x1xf32>
    %cst_69 = arith.constant 1.562500e-02 : f32
    %309 = vector.broadcast %cst_69 : f32 to vector<32x1xf32>
    %310 = arith.mulf %308, %309 : vector<32x1xf32>
    %cst_70 = arith.constant 9.99999996E-13 : f32
    %311 = vector.broadcast %cst_70 : f32 to vector<32x1xf32>
    %312 = arith.addf %310, %311 : vector<32x1xf32>
    %313 = math.rsqrt %312 : vector<32x1xf32>
    %314 = vector.broadcast %313 : vector<32x1xf32> to vector<32x128xf32>
    %315 = arith.mulf %305, %314 : vector<32x128xf32>
    %316 = vector.shape_cast %295 : vector<128xf32> to vector<1x128xf32>
    %317 = vector.broadcast %316 : vector<1x128xf32> to vector<32x128xf32>
    %318 = arith.mulf %315, %317 : vector<32x128xf32>
    %319 = vector.shape_cast %297 : vector<128xf32> to vector<1x128xf32>
    %320 = vector.broadcast %319 : vector<1x128xf32> to vector<32x128xf32>
    %321 = arith.addf %318, %320 : vector<32x128xf32>
    %322 = arith.truncf %321 : vector<32x128xf32> to vector<32x128xbf16>
    %c1_71 = arith.constant 1 : index
    %c0_72 = arith.constant 0 : index
    %c0_73 = arith.constant 0 : index
    %323 = vector.load %arg6[%c1_71, %c0_72, %c0_73] : memref<2x128x128xbf16, #tpu.memory_space<vmem>>, vector<1x128x128xbf16>
    %324 = vector.shape_cast %323 : vector<1x128x128xbf16> to vector<128x128xbf16>
    %cst_74 = arith.constant dense<0.000000e+00> : vector<32x128xf32>
    %325 = tpu.matmul %322, %324, %cst_74 {dimension_numbers = #tpu.dot_dimension_numbers<[1], [0], [0], [1], [0, 0, 1, 1], [], []>} : vector<32x128xbf16>, vector<128x128xbf16>, vector<32x128xf32> -> vector<32x128xf32>
    %326 = vector.extract_strided_slice %0 {offsets = [19, 0], sizes = [1, 128], strides = [1, 1]} : vector<24x128xf32> to vector<1x128xf32>
    %327 = vector.shape_cast %326 : vector<1x128xf32> to vector<128xf32>
    %328 = vector.shape_cast %327 : vector<128xf32> to vector<1x128xf32>
    %329 = vector.broadcast %328 : vector<1x128xf32> to vector<32x128xf32>
    %330 = arith.addf %325, %329 : vector<32x128xf32>
    %cst_75 = arith.constant 5.000000e-01 : f32
    %331 = vector.broadcast %cst_75 : f32 to vector<32x128xf32>
    %332 = arith.mulf %331, %330 : vector<32x128xf32>
    %cst_76 = arith.constant 4.471500e-02 : f32
    %333 = vector.broadcast %cst_76 : f32 to vector<32x128xf32>
    %334 = arith.mulf %333, %330 : vector<32x128xf32>
    %335 = arith.mulf %334, %330 : vector<32x128xf32>
    %336 = arith.mulf %335, %330 : vector<32x128xf32>
    %337 = arith.addf %330, %336 : vector<32x128xf32>
    %cst_77 = arith.constant 0.797884583 : f32
    %338 = vector.broadcast %cst_77 : f32 to vector<32x128xf32>
    %339 = arith.mulf %338, %337 : vector<32x128xf32>
    %340 = math.tanh %339 : vector<32x128xf32>
    %cst_78 = arith.constant 1.000000e+00 : f32
    %341 = vector.broadcast %cst_78 : f32 to vector<32x128xf32>
    %342 = arith.addf %341, %340 : vector<32x128xf32>
    %343 = arith.mulf %332, %342 : vector<32x128xf32>
    %344 = arith.truncf %343 : vector<32x128xf32> to vector<32x128xbf16>
    %c1_79 = arith.constant 1 : index
    %c0_80 = arith.constant 0 : index
    %c0_81 = arith.constant 0 : index
    %345 = vector.load %arg7[%c1_79, %c0_80, %c0_81] : memref<2x128x128xbf16, #tpu.memory_space<vmem>>, vector<1x128x128xbf16>
    %346 = vector.shape_cast %345 : vector<1x128x128xbf16> to vector<128x128xbf16>
    %cst_82 = arith.constant dense<0.000000e+00> : vector<32x128xf32>
    %347 = tpu.matmul %344, %346, %cst_82 {dimension_numbers = #tpu.dot_dimension_numbers<[1], [0], [0], [1], [0, 0, 1, 1], [], []>} : vector<32x128xbf16>, vector<128x128xbf16>, vector<32x128xf32> -> vector<32x128xf32>
    %348 = vector.extract_strided_slice %0 {offsets = [20, 0], sizes = [1, 128], strides = [1, 1]} : vector<24x128xf32> to vector<1x128xf32>
    %349 = vector.shape_cast %348 : vector<1x128xf32> to vector<128xf32>
    %350 = vector.shape_cast %349 : vector<128xf32> to vector<1x128xf32>
    %351 = vector.broadcast %350 : vector<1x128xf32> to vector<32x128xf32>
    %352 = arith.addf %347, %351 : vector<32x128xf32>
    %353 = arith.addf %352, %321 : vector<32x128xf32>
    %354 = vector.extract_strided_slice %0 {offsets = [21, 0], sizes = [1, 128], strides = [1, 1]} : vector<24x128xf32> to vector<1x128xf32>
    %355 = vector.shape_cast %354 : vector<1x128xf32> to vector<128xf32>
    %356 = vector.extract_strided_slice %0 {offsets = [22, 0], sizes = [1, 128], strides = [1, 1]} : vector<24x128xf32> to vector<1x128xf32>
    %357 = vector.shape_cast %356 : vector<1x128xf32> to vector<128xf32>
    %cst_83 = arith.constant dense<0.000000e+00> : vector<32xf32>
    %358 = vector.multi_reduction <add>, %353, %cst_83 [1] : vector<32x128xf32> to vector<32xf32>
    %359 = vector.shape_cast %358 : vector<32xf32> to vector<32x1xf32>
    %cst_84 = arith.constant 1.562500e-02 : f32
    %360 = vector.broadcast %cst_84 : f32 to vector<32x1xf32>
    %361 = arith.mulf %359, %360 : vector<32x1xf32>
    %362 = vector.broadcast %361 : vector<32x1xf32> to vector<32x128xf32>
    %363 = arith.subf %353, %362 : vector<32x128xf32>
    %364 = vector.broadcast %5 : vector<1x128xf32> to vector<32x128xf32>
    %365 = arith.mulf %363, %364 : vector<32x128xf32>
    %366 = arith.mulf %365, %365 : vector<32x128xf32>
    %cst_85 = arith.constant dense<0.000000e+00> : vector<32xf32>
    %367 = vector.multi_reduction <add>, %366, %cst_85 [1] : vector<32x128xf32> to vector<32xf32>
    %368 = vector.shape_cast %367 : vector<32xf32> to vector<32x1xf32>
    %cst_86 = arith.constant 1.562500e-02 : f32
    %369 = vector.broadcast %cst_86 : f32 to vector<32x1xf32>
    %370 = arith.mulf %368, %369 : vector<32x1xf32>
    %cst_87 = arith.constant 9.99999996E-13 : f32
    %371 = vector.broadcast %cst_87 : f32 to vector<32x1xf32>
    %372 = arith.addf %370, %371 : vector<32x1xf32>
    %373 = math.rsqrt %372 : vector<32x1xf32>
    %374 = vector.broadcast %373 : vector<32x1xf32> to vector<32x128xf32>
    %375 = arith.mulf %365, %374 : vector<32x128xf32>
    %376 = vector.shape_cast %355 : vector<128xf32> to vector<1x128xf32>
    %377 = vector.broadcast %376 : vector<1x128xf32> to vector<32x128xf32>
    %378 = arith.mulf %375, %377 : vector<32x128xf32>
    %379 = vector.shape_cast %357 : vector<128xf32> to vector<1x128xf32>
    %380 = vector.broadcast %379 : vector<1x128xf32> to vector<32x128xf32>
    %381 = arith.addf %378, %380 : vector<32x128xf32>
    %c0_88 = arith.constant 0 : index
    %c0_89 = arith.constant 0 : index
    %382 = vector.load %arg9[%c0_88, %c0_89] : memref<32x128xf32, #tpu.memory_space<vmem>>, vector<32x128xf32>
    tpu.vector_store %arg9[%c0_88, %c0_89], %381 {strides = array<i32>} : memref<32x128xf32, #tpu.memory_space<vmem>>, vector<32x128xf32>,
    %383 = arith.truncf %381 : vector<32x128xf32> to vector<32x128xbf16>
    %c0_90 = arith.constant 0 : index
    %c0_91 = arith.constant 0 : index
    %384 = vector.load %arg8[%c0_90, %c0_91] : memref<128x128xbf16, #tpu.memory_space<vmem>>, vector<128x128xbf16>
    %cst_92 = arith.constant dense<0.000000e+00> : vector<32x128xf32>
    %385 = tpu.matmul %383, %384, %cst_92 {dimension_numbers = #tpu.dot_dimension_numbers<[1], [0], [0], [1], [0, 0, 1, 1], [], []>} : vector<32x128xbf16>, vector<128x128xbf16>, vector<32x128xf32> -> vector<32x128xf32>
    %386 = vector.extract_strided_slice %0 {offsets = [2, 0], sizes = [1, 128], strides = [1, 1]} : vector<24x128xf32> to vector<1x128xf32>
    %387 = vector.shape_cast %386 : vector<1x128xf32> to vector<128xf32>
    %388 = vector.shape_cast %387 : vector<128xf32> to vector<1x128xf32>
    %389 = vector.broadcast %388 : vector<1x128xf32> to vector<32x128xf32>
    %390 = arith.addf %385, %389 : vector<32x128xf32>
    %c0_93 = arith.constant 0 : index
    %c0_94 = arith.constant 0 : index
    %391 = vector.load %arg10[%c0_93, %c0_94] : memref<32x128xf32, #tpu.memory_space<vmem>>, vector<32x128xf32>
    tpu.vector_store %arg10[%c0_93, %c0_94], %390 {strides = array<i32>} : memref<32x128xf32, #tpu.memory_space<vmem>>, vector<32x128xf32>,
    return
  }
  func.func @transform_0(%arg0: i32) -> (i32, i32) {
    %c0_i32 = arith.constant 0 : i32
    %c0_i32_0 = arith.constant 0 : i32
    %c0_i32_1 = arith.constant 0 : i32
    return %c0_i32, %c0_i32_0 : i32, i32
  }
  func.func @transform_1(%arg0: i32) -> (i32, i32) {
    %c0_i32 = arith.constant 0 : i32
    %c0_i32_0 = arith.constant 0 : i32
    %c0_i32_1 = arith.constant 0 : i32
    return %c0_i32, %c0_i32_0 : i32, i32
  }
  func.func @transform_2(%arg0: i32) -> (i32, i32) {
    %c0_i32 = arith.constant 0 : i32
    %c0_i32_0 = arith.constant 0 : i32
    %c0_i32_1 = arith.constant 0 : i32
    return %c0_i32, %c0_i32_0 : i32, i32
  }
  func.func @transform_3(%arg0: i32) -> (i32, i32, i32) {
    %c0_i32 = arith.constant 0 : i32
    %c0_i32_0 = arith.constant 0 : i32
    %c0_i32_1 = arith.constant 0 : i32
    %c0_i32_2 = arith.constant 0 : i32
    return %c0_i32, %c0_i32_0, %c0_i32_1 : i32, i32, i32
  }
  func.func @transform_4(%arg0: i32) -> (i32, i32, i32) {
    %c0_i32 = arith.constant 0 : i32
    %c0_i32_0 = arith.constant 0 : i32
    %c0_i32_1 = arith.constant 0 : i32
    %c0_i32_2 = arith.constant 0 : i32
    return %c0_i32, %c0_i32_0, %c0_i32_1 : i32, i32, i32
  }
  func.func @transform_5(%arg0: i32) -> (i32, i32, i32) {
    %c0_i32 = arith.constant 0 : i32
    %c0_i32_0 = arith.constant 0 : i32
    %c0_i32_1 = arith.constant 0 : i32
    %c0_i32_2 = arith.constant 0 : i32
    return %c0_i32, %c0_i32_0, %c0_i32_1 : i32, i32, i32
  }
  func.func @transform_6(%arg0: i32) -> (i32, i32, i32) {
    %c0_i32 = arith.constant 0 : i32
    %c0_i32_0 = arith.constant 0 : i32
    %c0_i32_1 = arith.constant 0 : i32
    %c0_i32_2 = arith.constant 0 : i32
    return %c0_i32, %c0_i32_0, %c0_i32_1 : i32, i32, i32
  }
  func.func @transform_7(%arg0: i32) -> (i32, i32) {
    %c0_i32 = arith.constant 0 : i32
    %c0_i32_0 = arith.constant 0 : i32
    %c0_i32_1 = arith.constant 0 : i32
    return %c0_i32, %c0_i32_0 : i32, i32
  }
  func.func @transform_8(%arg0: i32) -> (i32, i32) {
    %c0_i32 = arith.constant 0 : i32
    %c0_i32_0 = arith.constant 0 : i32
    %c0_i32_1 = arith.constant 0 : i32
    return %c0_i32, %c0_i32_0 : i32, i32
  }
  func.func @transform_9(%arg0: i32) -> (i32, i32) {
    %c0_i32 = arith.constant 0 : i32
    %c0_i32_0 = arith.constant 0 : i32
    %c0_i32_1 = arith.constant 0 : i32
    return %c0_i32, %c0_i32_0 : i32, i32
  }
}

</mosaic_0001>

<bundles_post_ra>
// kernel: bert_for_sequence_classification.1
= control target key start
LH: loop header
LB: loop body
LE: loop exit
PB: predicated region body
PF: predicated region fallthrough
CT: control target
= control target key end

     0   :  { %15 = vsyncpa [#allocation3], 0  ;;  %s3998_s0 = inlined_call_operand.vmem [shape: f32[32,128], index: 0, kind: input, shape index: {}]   ;;  %s3999_s1 = inlined_call_operand.vmem [shape: f32[1,32], index: 1, kind: input, shape index: {}]   ;;  %s4000_s2 = inlined_call_operand.vmem [shape: f32[24,128], index: 2, kind: input, shape index: {}]   ;;  %s4001_s3 = inlined_call_operand.vmem [shape: bf16[2,128,384], index: 3, kind: input, shape index: {}]   ;;  %s4002_s4 = inlined_call_operand.vmem [shape: bf16[2,128,128], index: 4, kind: input, shape index: {}]   ;;  %s4003_s5 = inlined_call_operand.vmem [shape: bf16[2,128,128], index: 5, kind: input, shape index: {}]   ;;  %s4004_s6 = inlined_call_operand.hbm [shape: bf16[2,128,128], index: 6, kind: input, shape index: {}]   ;;  %s4005_s7 = inlined_call_operand.hbm [shape: bf16[128,128], index: 7, kind: input, shape index: {}]   ;;  %s4006_s8 = inlined_call_operand.vmem [shape: f32[32,128], index: 8, kind: output, shape index: {0}]   ;;  %s4007_s9 = inlined_call_operand.vmem [shape: f32[32,128], index: 9, kind: output, shape index: {1}]  }
   0x1   :  { %16 = vsyncpa [#allocation5], 0  ;;  %s3321_s30 = smov [#allocation2]  }
   0x2   :  { %s34_s10 = sshll.u32 %s3321_s30, 4  ;;  %s35_s10 = int_to_ptr.vmem [resolvable:$true] %s34_s10 }
   0x3   :  { %s3285_s11 = scalar_lea.vmem %s35_s10, 2048  ;;  %p3290_p1 = scmp.lt.s32.totalorder %s35_s10, %s35_s10 }
   0x4   :  { %p3286_p0 = scmp.ne.s32.totalorder %s35_s10, %s3285_s11  ;;  %p3291_p2 = scmp.lt.s32.totalorder %s3285_s11, %s3285_s11 }
   0x6   :  { %p3292_p3 = por %p3291_p2, %p3290_p1 }
   0x8   :  { %p3293_p4 = pnand %p3292_p3, %p3286_p0 }
   0xa   :  { %3296 = shalt.err (!%p3293_p4)
}
   0xb   :  { %s3322_s12 = smov 64   ;;  %s3323_s13 = smov 4  }
   0xc   :  { %40 = dma.hbm_to_vmem [thread:$0]  %s4004_s6, 2048, %s35_s10, [#allocation3], %s3322_s12, %s3322_s12, %s3323_s13  }
   0xd   :  { %s3324_s16 = smov [#allocation4]  }
   0xe   :  { %s46_s17 = sshll.u32 %s3324_s16, 4  ;;  %s47_s17 = int_to_ptr.vmem [resolvable:$true] %s46_s17 }
   0xf   :  { %s3305_s18 = scalar_lea.vmem %s47_s17, 1024  ;;  %p3310_p6 = scmp.lt.s32.totalorder %s47_s17, %s47_s17 }
  0x10   :  { %p3306_p5 = scmp.ne.s32.totalorder %s47_s17, %s3305_s18  ;;  %p3311_p7 = scmp.lt.s32.totalorder %s3305_s18, %s3305_s18 }
  0x12   :  { %p3312_p8 = por %p3311_p7, %p3310_p6 }
  0x14   :  { %p3313_p9 = pnand %p3312_p8, %p3306_p5 }
  0x16   :  { %3316 = shalt.err (!%p3313_p9)
}
  0x17   :  { %52 = dma.hbm_to_vmem [thread:$0]  %s4005_s7, 1024, %s47_s17, [#allocation5], %s3322_s12, %s3322_s12, %s3323_s13  }
  0x18   :  { %3317 = dma.done.wait [#allocation3], 2048  }
  0x19   :  { %3318 = vsyncadd [#allocation3], 4294965248 }
  0x1a   :  { %3319 = dma.done.wait [#allocation5], 1024  }
  0x1b   :  { %3320 = vsyncadd [#allocation5], 4294966272  ;;  %v141_v0 = vld [vmem:[%s3998_s0] sm:$0xff]  ;;  %v143_v1 = vld [vmem:[%s3998_s0 + $0x10] sm:$0xff]  ;;  %v63_v6 = vlaneseq  ;;  %v3325_v12 = vmov 0.0   ;;  %v3326_v47 = vmov 0  }
  0x1c   :  { %v142_v2 = vld [vmem:[%s3998_s0 + $0x8] sm:$0xff]  ;;  %145 = vadd.xlane.f32.xlu0 %v141_v0  ;;  %149 = vadd.xlane.f32.xlu1 %v143_v1  ;;  %v144_v3 = vld [vmem:[%s3998_s0 + $0x18] sm:$0xff]  ;;  %v3039_v30 = vld [vmem:[%s4001_s3 + $0x94] ss:$12 sps:$4 sm:$0xff]   ;;  %vm578_vm7 = vcmask 261120  }
  0x1d   :  { %v3036_v4 = vld [vmem:[%s4001_s3 + $0xac] ss:$12 sps:$4 sm:$0xff]   ;;  %v3038_v5 = vld [vmem:[%s4001_s3 + $0xa8] ss:$12 sps:$4 sm:$0xff]   ;;  %v3402_v7 = vand.u32 127, %v63_v6  ;;  %403 = vmatprep.mubr.bf16.mxu0 %v3326_v47 }
  0x1e   :  { %371 = vmatprep.subr.bf16.mxu0 %v3036_v4  ;;  %v3041_v31 = vld [vmem:[%s4001_s3 + $0xb0] ss:$12 sps:$4 sm:$0xff]   ;;  %v3045_v34 = vld [vmem:[%s4001_s3 + $0x98] ss:$12 sps:$4 sm:$0xff]   ;;  %v3049_v37 = vld [vmem:[%s4001_s3 + $0x80] ss:$12 sps:$4 sm:$0xff]  }
  0x1f   :  { %372 = vmatpush1.bf16.msra.mxu0 %v3038_v5  ;;  %vm65_vm0 = vcmp.lt.s32.totalorder %v3402_v7, 64  ;;  %v3042_v32 = vld [vmem:[%s4001_s3 + $0x90] ss:$12 sps:$4 sm:$0xff]   ;;  %2802 = vmatprep.subr.bf16.mxu1 %v3041_v31  ;;  %v3046_v35 = vld [vmem:[%s4001_s3 + $0x78] ss:$12 sps:$4 sm:$0xff]   ;;  %vm69_vm1 = vcmp.lt.s32.totalorder %v3402_v7, 32 }
  0x20   :  { %147 = vadd.xlane.f32.xlu0 %v142_v2  ;;  %151 = vadd.xlane.f32.xlu1 %v144_v3  ;;  %v3408_v13 = vsel %vm65_vm0, 1.0, %v3325_v12  ;;  %v3043_v33 = vld [vmem:[%s4001_s3 + $0x7c] ss:$12 sps:$4 sm:$0xff]   ;;  %v3047_v36 = vld [vmem:[%s4001_s3 + $0x64] ss:$12 sps:$4 sm:$0xff]   ;;  %vm73_vm2 = vcmp.ge.s32.totalorder %v3402_v7, 32 }
  0x21   :  { %373 = vmatprep.subr.bf16.mxu0 %v3039_v30  ;;  %2803 = vmatpush3.bf16.msra.mxu1 %v3041_v31  ;;  %v3050_v38 = vld [vmem:[%s4001_s3 + $0x60] ss:$12 sps:$4 sm:$0xff]   ;;  %v3053_v40 = vld [vmem:[%s4001_s3 + $0x68] ss:$12 sps:$4 sm:$0xff]   ;;  %v3057_v43 = vld [vmem:[%s4001_s3 + $0x50] ss:$12 sps:$4 sm:$0xff]  }
  0x22   :  { %2804 = vmatprep.subr.bf16.mxu1 %v3045_v34  ;;  %v3051_v39 = vld [vmem:[%s4001_s3 + $0x4c] ss:$12 sps:$4 sm:$0xff]   ;;  %v3054_v41 = vld [vmem:[%s4001_s3 + $0x48] ss:$12 sps:$4 sm:$0xff]   ;;  %v3058_v44 = vld [vmem:[%s4001_s3 + $0x30] ss:$12 sps:$4 sm:$0xff]  }
  0x23   :  { %374 = vmatpush1.bf16.msra.mxu0 %v3042_v32  ;;  %v3055_v42 = vld [vmem:[%s4001_s3 + $0x34] ss:$12 sps:$4 sm:$0xff]   ;;  %v3059_v45 = vld [vmem:[%s4001_s3 + $0x1c] ss:$12 sps:$4 sm:$0xff]   ;;  %v3061_v46 = vld [vmem:[%s4001_s3 + $0x38] ss:$12 sps:$4 sm:$0xff]  }
  0x24   :  { %375 = vmatprep.subr.bf16.mxu0 %v3043_v33  ;;  %v3062_v48 = vld [vmem:[%s4001_s3 + $0x18] ss:$12 sps:$4 sm:$0xff]   ;;  %v3065_v50 = vld [vmem:[%s4001_s3 + $0x20] ss:$12 sps:$4 sm:$0xff]   ;;  %v3067_v52 = vld [vmem:[%s4001_s3 + $0x8] ss:$12 sps:$4 sm:$0xff]  }
  0x25   :  { %2805 = vmatpush3.bf16.msra.mxu1 %v3045_v34  ;;  %v3063_v49 = vld [vmem:[%s4001_s3 + $0x4] ss:$12 sps:$4 sm:$0xff]   ;;  %v3066_v51 = vld [vmem:[%s4001_s3] ss:$12 sps:$4 sm:$0xff]   ;;  %v3544_v34 = vsel %vm69_vm1, 1.0, %v3325_v12  ;;  %vm74_vm3 = vmand %vm73_vm2, %vm65_vm0  ;;  %vm115_vm4 = vcmp.ge.s32.totalorder %v3402_v7, 16 }
  0x26   :  { %2806 = vmatprep.subr.bf16.mxu1 %v3049_v37  ;;  %vm98_vm5 = vcmp.lt.s32.totalorder %v3402_v7, 16  ;;  %vm122_vm6 = vmand %vm115_vm4, %vm69_vm1 }
  0x27   :  { %376 = vmatpush1.bf16.msra.mxu0 %v3046_v35 }
  0x28   :  { %377 = vmatprep.subr.bf16.mxu0 %v3047_v36 }
  0x29   :  { %2807 = vmatpush3.bf16.msra.mxu1 %v3049_v37 }
  0x2a   :  { %2808 = vmatprep.subr.bf16.mxu1 %v3053_v40 }
  0x2b   :  { %378 = vmatpush1.bf16.msra.mxu0 %v3050_v38 }
  0x2c   :  { %379 = vmatprep.subr.bf16.mxu0 %v3051_v39 }
  0x2d   :  { %2809 = vmatpush3.bf16.msra.mxu1 %v3053_v40 }
  0x2e   :  { %2810 = vmatprep.subr.bf16.mxu1 %v3057_v43 }
  0x2f   :  { %380 = vmatpush1.bf16.msra.mxu0 %v3054_v41 }
  0x30   :  { %381 = vmatprep.subr.bf16.mxu0 %v3055_v42 }
  0x31   :  { %2811 = vmatpush3.bf16.msra.mxu1 %v3057_v43 }
  0x32   :  { %2812 = vmatprep.subr.bf16.mxu1 %v3061_v46 }
  0x33   :  { %382 = vmatpush1.bf16.msra.mxu0 %v3058_v44 }
  0x34   :  { %383 = vmatprep.subr.bf16.mxu0 %v3059_v45 }
  0x35   :  { %2813 = vmatpush3.bf16.msra.mxu1 %v3061_v46 }
  0x36   :  { %2814 = vmatprep.subr.bf16.mxu1 %v3065_v50 }
  0x37   :  { %384 = vmatpush1.bf16.msra.mxu0 %v3062_v48 }
  0x38   :  { %385 = vmatprep.subr.bf16.mxu0 %v3063_v49 }
  0x39   :  { %2815 = vmatpush3.bf16.msra.mxu1 %v3065_v50 }
  0x3a   :  { %2816 = vmatprep.subr.bf16.mxu1 %v3067_v52 }
  0x3b   :  { %386 = vmatpush1.bf16.msra.mxu0 %v3066_v51 }
  0x3d   :  { %2817 = vmatpush3.bf16.msra.mxu1 %v3067_v52 }
  0xa5   :  { %v146_v8 = vpop.xlane.xlu0 %145  ;;  %v150_v9 = vpop.xlane.xlu1 %149 }
  0xa6   :  { %v153_v10 = vmul.f32 0.015625, %v146_v8  ;;  %v155_v11 = vmul.f32 0.015625, %v150_v9 }
  0xa8   :  { %v157_v14 = vsub.f32 %v141_v0, %v153_v10  ;;  %v159_v15 = vsub.f32 %v143_v1, %v155_v11  ;;  %v3498_v1 = vshrl.u32 %v63_v6, 7 }
  0xa9   :  { %v148_v16 = vpop.xlane.xlu0 %147  ;;  %v152_v17 = vpop.xlane.xlu1 %151 }
  0xaa   :  { %v154_v18 = vmul.f32 0.015625, %v148_v16  ;;  %v156_v19 = vmul.f32 0.015625, %v152_v17  ;;  %v3411_v20 = vmul.f32 %v3408_v13, %v157_v14  ;;  %v3414_v21 = vmul.f32 %v3408_v13, %v159_v15 }
  0xab   :  { %v3512_v9 = vsub.s32 1, %v3498_v1  ;;  %v3539_v31 = vsub.s32 5, %v3498_v1  ;;  %v3551_v45 = vsub.s32 4, %v3498_v1 }
  0xac   :  { %v158_v22 = vsub.f32 %v142_v2, %v154_v18  ;;  %v160_v23 = vsub.f32 %v144_v3, %v156_v19  ;;  %v165_v24 = vmul.f32 %v3411_v20, %v3411_v20  ;;  %v167_v25 = vmul.f32 %v3414_v21, %v3414_v21  ;;  %v3506_v3 = vld [vmem:[%s4000_s2] sm:$0xff] }
  0xad   :  { %v3501_v2 = vsub.s32 0, %v3498_v1  ;;  %v204_v15 = vrot.slane %v3506_v3, %v3512_v9  ;;  %v494_v38 = vrot.slane %v3506_v3, %v3539_v31 }
  0xae   :  { %169 = vadd.xlane.f32.xlu0 %v165_v24  ;;  %v3421_v26 = vmul.f32 %v3408_v13, %v158_v22  ;;  %v3424_v27 = vmul.f32 %v3408_v13, %v160_v23 }
  0xaf   :  { %v196_v8 = vrot.slane %v3506_v3, %v3501_v2 }
  0xb0   :  { %v166_v28 = vmul.f32 %v3421_v26, %v3421_v26  ;;  %v168_v29 = vmul.f32 %v3424_v27, %v3424_v27 }
  0xb2   :  { %173 = vadd.xlane.f32.xlu0 %v167_v25  ;;  %171 = vadd.xlane.f32.xlu1 %v166_v28 }
  0xb6   :  { %175 = vadd.xlane.f32.xlu1 %v168_v29 }
 0x137   :  { %v170_v53 = vpop.xlane.xlu0 %169 }
 0x138   :  { %v177_v54 = vmul.f32 0.015625, %v170_v53 }
 0x13a   :  { %v181_v55 = vadd.f32 1e-12, %v177_v54 }
 0x13b   :  { %v172_v56 = vpop.xlane.xlu1 %171  ;;  %v174_v57 = vpop.xlane.xlu0 %173 }
 0x13c   :  { %3156 = vrsqrt.f32 %v181_v55  ;;  %v178_v58 = vmul.f32 0.015625, %v172_v56  ;;  %v179_v59 = vmul.f32 0.015625, %v174_v57  ;;  %v484_v56 = vrot.slane %v3506_v3, %v3551_v45 }
 0x13e   :  { %v182_v60 = vadd.f32 1e-12, %v178_v58  ;;  %v183_v61 = vadd.f32 1e-12, %v179_v59 }
 0x13f   :  { %v176_v62 = vpop.xlane.xlu1 %175 }
 0x140   :  { %3158 = vrsqrt.f32 %v182_v60  ;;  %v180_v63 = vmul.f32 0.015625, %v176_v62 }
 0x141   :  { %3160 = vrsqrt.f32 %v183_v61 }
 0x142   :  { %v184_v0 = vadd.f32 1e-12, %v180_v63 }
 0x144   :  { %3162 = vrsqrt.f32 %v184_v0 }
 0x149   :  { %v3157_v4 = vpop.eup %3156 }
 0x14a   :  { %v189_v5 = vmul.f32 %v3157_v4, %v3411_v20 }
 0x14c   :  { %v197_v14 = vmul.f32 %v196_v8, %v189_v5 }
 0x14d   :  { %v3159_v6 = vpop.eup %3158 }
 0x14e   :  { %v3161_v10 = vpop.eup %3160  ;;  %v190_v11 = vmul.f32 %v3159_v6, %v3421_v26  ;;  %v3518_v19 = vadd.f32 %v204_v15, %v197_v14 }
 0x14f   :  { %v191_v16 = vmul.f32 %v3161_v10, %v3414_v21 }
 0x150   :  { %v198_v17 = vmul.f32 %v196_v8, %v190_v11 }
 0x151   :  { %v3163_v18 = vpop.eup %3162  ;;  %v199_v23 = vmul.f32 %v196_v8, %v191_v16 }
 0x152   :  { %v3520_v20 = vadd.f32 %v204_v15, %v198_v17  ;;  %v192_v22 = vmul.f32 %v3163_v18, %v3424_v27  ;;  %v3533_v27 = vsub.s32 3, %v3498_v1 }
 0x153   :  { %v3525_v26 = vadd.f32 %v204_v15, %v199_v23 }
 0x154   :  { %v209_v24 = vpack.c.bf16 %v3520_v20, %v3518_v19  ;;  %v200_v25 = vmul.f32 %v196_v8, %v192_v22  ;;  %v476_v29 = vrot.slane %v3506_v3, %v3533_v27  ;;  %v3559_v8 = vsel %vm74_vm3, 1.0, %v3325_v12  ;;  %v128_v12 = vld [vmem:[%s3999_s1] sm:$0x1] }
 0x155   :  { %v129_v23 = vsub.f32 1.0, %v128_v12 }
 0x156   :  { %404 = vmatmul.mubr.bf16.vlgmr.msra.gmra.mxu0 %v209_v24  ;;  %2818 = vmatprep.mubr.bf16.mxu1 %v209_v24  ;;  %v3527_v28 = vadd.f32 %v204_v15, %v200_v25 }
 0x157   :  { %413 = vmatprep.mubr.bf16.mxu0 %v3326_v47  ;;  %v130_v24 = vmul.f32 -10000.0, %v129_v23 }
 0x158   :  { %v210_v21 = vpack.c.bf16 %v3527_v28, %v3525_v26 }
 0x159   :  { %v135_v25 = vrot.slane %v130_v24, %v3501_v2 }
 0x15a   :  { %2819 = vmatmul.mubr.bf16.vlgmr.msra.gmra.mxu1 %v210_v21 }
 0x15e   :  { %414 = vmatmul.mubr.bf16.gmra.mxu0 %v210_v21 }
 0x216   :  { %v405_v30 = vpop.f32.mrf.mxu0 }
 0x217   :  { %v477_v33 = vadd.f32 %v476_v29, %v405_v30  ;;  %v3577_v30 = vsel %vm122_vm6, %v135_v25, -30000.0 }
 0x218   :  { %v407_v32 = vpop.f32.mrf.mxu0 }
 0x219   :  { %v501_v41 = vmul.f32 %v3544_v34, %v477_v33  ;;  %v485_v62 = vadd.f32 %v484_v56, %v407_v32  ;;  %v505_v14 = vmul.f32 %v3559_v8, %v477_v33 }
 0x21a   :  { %v409_v35 = vpop.f32.mrf.mxu0  ;;  %v2820_v36 = vpop.f32.mrf.mxu1 }
 0x21b   :  { %v478_v37 = vadd.f32 %v476_v29, %v409_v35  ;;  %v497_v46 = vadd.f32 %v2820_v36, %v494_v38 }
 0x21c   :  { %v411_v39 = vpop.f32.mrf.mxu0  ;;  %v458_v40 = vpop.f32.mrf.mxu1 }
 0x21d   :  { %v502_v42 = vmul.f32 %v3544_v34, %v478_v37  ;;  %v495_v53 = vadd.f32 %v494_v38, %v458_v40  ;;  %v486_v59 = vadd.f32 %v484_v56, %v411_v39  ;;  %v506_v10 = vmul.f32 %v3559_v8, %v478_v37 }
 0x21e   :  { %v415_v43 = vpop.f32.mrf.mxu0  ;;  %v2821_v44 = vpop.f32.mrf.mxu1 }
 0x21f   :  { %v498_v48 = vadd.f32 %v2821_v44, %v494_v38  ;;  %v509_v49 = vpack.c.bf16 %v502_v42, %v501_v41  ;;  %v489_v0 = vpack.c.bf16 %v486_v59, %v485_v62  ;;  %v479_v5 = vadd.f32 %v476_v29, %v415_v43 }
 0x220   :  { %v417_v50 = vpop.f32.mrf.mxu0  ;;  %v461_v51 = vpop.f32.mrf.mxu1  ;;  %v511_v16 = vpack.c.bf16 %v506_v10, %v505_v14 }
 0x221   :  { %v500_v52 = vpack.c.bf16 %v498_v48, %v497_v46  ;;  %2826 = vmatprep.mubr.bf16.mxu0 %v509_v49  ;;  %v496_v54 = vadd.f32 %v494_v38, %v461_v51  ;;  %v487_v60 = vadd.f32 %v484_v56, %v417_v50  ;;  %v503_v11 = vmul.f32 %v3544_v34, %v479_v5 }
 0x222   :  { %v419_v55 = vpop.f32.mrf.mxu0  ;;  %v507_v18 = vmul.f32 %v3559_v8, %v479_v5 }
 0x223   :  { %2834 = vmatprep.subr.bf16.mxu1 %v500_v52  ;;  %v499_v57 = vpack.c.bf16 %v496_v54, %v495_v53  ;;  %v480_v4 = vadd.f32 %v476_v29, %v419_v55  ;;  %v3575_v29 = vsel %vm98_vm5, %v135_v25, -30000.0 }
 0x224   :  { %v421_v58 = vpop.f32.mrf.mxu0  ;;  %2835 = vmatpush3.bf16.msra.mxu1 %v500_v52 }
 0x225   :  { %v488_v61 = vadd.f32 %v484_v56, %v421_v58  ;;  %2836 = vmatprep.subr.bf16.mxu1 %v499_v57  ;;  %v504_v6 = vmul.f32 %v3544_v34, %v480_v4  ;;  %v508_v17 = vmul.f32 %v3559_v8, %v480_v4 }
 0x227   :  { %v490_v63 = vpack.c.bf16 %v488_v61, %v487_v60  ;;  %v510_v15 = vpack.c.bf16 %v504_v6, %v503_v11  ;;  %v512_v22 = vpack.c.bf16 %v508_v17, %v507_v18 }
 0x228   :  { %2837 = vmatpush3.bf16.msra.mxu1 %v499_v57 }
 0x229   :  { %2822 = vmatprep.subr.bf16.mxu0 %v490_v63 }
 0x22a   :  { %2823 = vmatpush3.bf16.xpose.msra.mxu0 %v490_v63 }
 0x22b   :  { %2824 = vmatprep.subr.bf16.mxu0 %v489_v0 }
 0x232   :  { %2825 = vmatpush3.bf16.xpose.msra.mxu0 %v489_v0 }
 0x239   :  { %2827 = vmatmul.mubr.bf16.vlgmr.msra.gmra.mxu0 %v510_v15 }
 0x23a   :  { %2830 = vmatprep.mubr.bf16.mxu0 %v511_v16 }
 0x241   :  { %2831 = vmatmul.mubr.bf16.gmra.mxu0 %v512_v22 }
 0x2f9   :  { %v2828_v21 = vpop.f32.mrf.mxu0 }
 0x2fa   :  { %v556_v36 = vadd.f32 %v2828_v21, %v3577_v30 }
 0x2fb   :  { %v547_v32 = vpop.f32.mrf.mxu0 }
 0x2fc   :  { %v548_v33 = vadd.f32 %v547_v32, %v3575_v29  ;;  %v585_v42 = vsel %vm578_vm7, %v556_v36, -inf }
 0x2fd   :  { %v2829_v35 = vpop.f32.mrf.mxu0 }
 0x2fe   :  { %v579_v37 = vsel %vm578_vm7, %v548_v33, -inf  ;;  %v559_v40 = vadd.f32 %v2829_v35, %v3577_v30 }
 0x2ff   :  { %v550_v38 = vpop.f32.mrf.mxu0  ;;  %580 = vmax.xlane.f32.xlu0 %v579_v37 }
 0x300   :  { %v551_v39 = vadd.f32 %v550_v38, %v3575_v29  ;;  %v588_v49 = vsel %vm578_vm7, %v559_v40, -inf }
 0x301   :  { %v2832_v7 = vpop.f32.mrf.mxu0 }
 0x302   :  { %v582_v41 = vsel %vm578_vm7, %v551_v39, -inf  ;;  %v572_v48 = vadd.f32 %v2832_v7, %v3577_v30 }
 0x303   :  { %v563_v43 = vpop.f32.mrf.mxu0  ;;  %583 = vmax.xlane.f32.xlu1 %v582_v41  ;;  %586 = vmax.xlane.f32.xlu0 %v585_v42 }
 0x304   :  { %v564_v44 = vadd.f32 %v563_v43, %v3575_v29  ;;  %v597_v55 = vsel %vm578_vm7, %v572_v48, -inf }
 0x305   :  { %v2833_v46 = vpop.f32.mrf.mxu0 }
 0x306   :  { %v591_v50 = vsel %vm578_vm7, %v564_v44, -inf  ;;  %v575_v53 = vadd.f32 %v2833_v46, %v3577_v30 }
 0x307   :  { %v566_v51 = vpop.f32.mrf.mxu0  ;;  %589 = vmax.xlane.f32.xlu1 %v588_v49  ;;  %592 = vmax.xlane.f32.xlu0 %v591_v50  ;;  %v3068_v50 = vld [vmem:[%s4002_s4 + $0x38] sm:$0xff]  }
 0x308   :  { %v567_v52 = vadd.f32 %v566_v51, %v3575_v29  ;;  %v600_v56 = vsel %vm578_vm7, %v575_v53, -inf  ;;  %2846 = vmatprep.subr.bf16.mxu1 %v3068_v50 }
 0x30a   :  { %v594_v54 = vsel %vm578_vm7, %v567_v52, -inf }
 0x30b   :  { %595 = vmax.xlane.f32.xlu1 %v594_v54  ;;  %598 = vmax.xlane.f32.xlu0 %v597_v55 }
 0x30f   :  { %601 = vmax.xlane.f32.xlu1 %v600_v56 }
 0x388   :  { %v581_v57 = vpop.xlane.xlu0 %580 }
 0x389   :  { %v603_v58 = vsub.f32 %v548_v33, %v581_v57 }
 0x38b   :  { %v611_v59 = vmul.f32 1.442695, %v603_v58 }
 0x38c   :  { %v584_v60 = vpop.xlane.xlu1 %583  ;;  %v587_v61 = vpop.xlane.xlu0 %586 }
 0x38d   :  { %3164 = vpow2.f32 %v611_v59  ;;  %v604_v62 = vsub.f32 %v551_v39, %v584_v60  ;;  %v605_v63 = vsub.f32 %v556_v36, %v587_v61 }
 0x38f   :  { %v613_v0 = vmul.f32 1.442695, %v604_v62  ;;  %v615_v4 = vmul.f32 1.442695, %v605_v63 }
 0x390   :  { %v590_v5 = vpop.xlane.xlu1 %589  ;;  %v593_v6 = vpop.xlane.xlu0 %592 }
 0x391   :  { %3166 = vpow2.f32 %v613_v0  ;;  %v606_v10 = vsub.f32 %v559_v40, %v590_v5  ;;  %v607_v11 = vsub.f32 %v564_v44, %v593_v6 }
 0x392   :  { %3168 = vpow2.f32 %v615_v4 }
 0x393   :  { %v617_v14 = vmul.f32 1.442695, %v606_v10  ;;  %v619_v15 = vmul.f32 1.442695, %v607_v11 }
 0x394   :  { %v596_v16 = vpop.xlane.xlu1 %595  ;;  %v599_v17 = vpop.xlane.xlu0 %598 }
 0x395   :  { %3170 = vpow2.f32 %v617_v14  ;;  %v608_v18 = vsub.f32 %v567_v52, %v596_v16  ;;  %v609_v22 = vsub.f32 %v572_v48, %v599_v17  ;;  %v3069_v14 = vld [vmem:[%s4002_s4 + $0x30] sm:$0xff]  }
 0x396   :  { %3172 = vpow2.f32 %v619_v15 }
 0x397   :  { %v621_v12 = vmul.f32 1.442695, %v608_v18  ;;  %v623_v23 = vmul.f32 1.442695, %v609_v22 }
 0x398   :  { %v602_v24 = vpop.xlane.xlu1 %601 }
 0x399   :  { %3174 = vpow2.f32 %v621_v12  ;;  %v610_v25 = vsub.f32 %v575_v53, %v602_v24  ;;  %v3070_v12 = vld [vmem:[%s4002_s4 + $0x28] sm:$0xff]  }
 0x39a   :  { %v3165_v21 = vpop.eup %3164  ;;  %3176 = vpow2.f32 %v623_v23 }
 0x39b   :  { %v625_v32 = vmul.f32 1.442695, %v610_v25  ;;  %v627_v33 = vsel %vm578_vm7, %v3165_v21, 0.0 }
 0x39c   :  { %628 = vadd.xlane.f32.xlu0 %v627_v33  ;;  %v3072_v33 = vld [vmem:[%s4002_s4 + $0x18] sm:$0xff]  }
 0x39d   :  { %3178 = vpow2.f32 %v625_v32  ;;  %v3071_v32 = vld [vmem:[%s4002_s4 + $0x20] sm:$0xff]  }
 0x39e   :  { %v3167_v35 = vpop.eup %3166 }
 0x39f   :  { %v3169_v36 = vpop.eup %3168  ;;  %v630_v37 = vsel %vm578_vm7, %v3167_v35, 0.0 }
 0x3a0   :  { %631 = vadd.xlane.f32.xlu1 %v630_v37  ;;  %v633_v38 = vsel %vm578_vm7, %v3169_v36, 0.0  ;;  %v3075_v37 = vld [vmem:[%s4002_s4] sm:$0xff]  }
 0x3a1   :  { %634 = vadd.xlane.f32.xlu0 %v633_v38 }
 0x3a2   :  { %v3171_v39 = vpop.eup %3170 }
 0x3a3   :  { %v3173_v7 = vpop.eup %3172  ;;  %v636_v40 = vsel %vm578_vm7, %v3171_v39, 0.0 }
 0x3a4   :  { %637 = vadd.xlane.f32.xlu1 %v636_v40  ;;  %v639_v41 = vsel %vm578_vm7, %v3173_v7, 0.0 }
 0x3a5   :  { %640 = vadd.xlane.f32.xlu0 %v639_v41 }
 0x3a6   :  { %v3175_v42 = vpop.eup %3174 }
 0x3a7   :  { %v3177_v43 = vpop.eup %3176  ;;  %v642_v44 = vsel %vm578_vm7, %v3175_v42, 0.0 }
 0x3a8   :  { %643 = vadd.xlane.f32.xlu1 %v642_v44  ;;  %v645_v46 = vsel %vm578_vm7, %v3177_v43, 0.0 }
 0x3a9   :  { %646 = vadd.xlane.f32.xlu0 %v645_v46 }
 0x3aa   :  { %v3179_v48 = vpop.eup %3178 }
 0x3ab   :  { %v648_v49 = vsel %vm578_vm7, %v3179_v48, 0.0 }
 0x3ac   :  { %649 = vadd.xlane.f32.xlu1 %v648_v49 }
 0x425   :  { %v629_v51 = vpop.xlane.xlu0 %628 }
 0x426   :  { %3180 = vrcp.f32 %v629_v51 }
 0x429   :  { %v632_v52 = vpop.xlane.xlu1 %631 }
 0x42a   :  { %3182 = vrcp.f32 %v632_v52  ;;  %v635_v53 = vpop.xlane.xlu0 %634 }
 0x42b   :  { %3184 = vrcp.f32 %v635_v53 }
 0x42d   :  { %v638_v54 = vpop.xlane.xlu1 %637 }
 0x42e   :  { %3186 = vrcp.f32 %v638_v54  ;;  %v641_v55 = vpop.xlane.xlu0 %640 }
 0x42f   :  { %3188 = vrcp.f32 %v641_v55 }
 0x431   :  { %v644_v56 = vpop.xlane.xlu1 %643 }
 0x432   :  { %3190 = vrcp.f32 %v644_v56  ;;  %v647_v57 = vpop.xlane.xlu0 %646 }
 0x433   :  { %3192 = vrcp.f32 %v647_v57  ;;  %v3181_v58 = vpop.eup %3180 }
 0x434   :  { %v659_v61 = vmul.f32 %v3181_v58, %v3165_v21 }
 0x435   :  { %v650_v59 = vpop.xlane.xlu1 %649 }
 0x436   :  { %3194 = vrcp.f32 %v650_v59 }
 0x437   :  { %v3183_v60 = vpop.eup %3182 }
 0x438   :  { %v660_v62 = vmul.f32 %v3183_v60, %v3167_v35  ;;  %v3185_v63 = vpop.eup %3184  ;;  %v3073_v35 = vld [vmem:[%s4002_s4 + $0x10] sm:$0xff]  }
 0x439   :  { %v661_v5 = vmul.f32 %v3185_v63, %v3169_v36  ;;  %v3074_v36 = vld [vmem:[%s4002_s4 + $0x8] sm:$0xff]  }
 0x43a   :  { %v667_v0 = vpack.c.bf16 %v660_v62, %v659_v61  ;;  %v3640_v61 = vsub.s32 6, %v3498_v1 }
 0x43b   :  { %v3187_v4 = vpop.eup %3186 }
 0x43c   :  { %2838 = vmatprep.mubr.msk.bf16.mxu1 %vm578_vm7, %v667_v0  ;;  %v662_v6 = vmul.f32 %v3187_v4, %v3171_v39  ;;  %v3189_v10 = vpop.eup %3188  ;;  %v781_v63 = vrot.slane %v3506_v3, %v3640_v61 }
 0x43d   :  { %v663_v16 = vmul.f32 %v3189_v10, %v3173_v7 }
 0x43e   :  { %v668_v11 = vpack.c.bf16 %v662_v6, %v661_v5 }
 0x43f   :  { %v3191_v15 = vpop.eup %3190 }
 0x440   :  { %2839 = vmatmul.mubr.msk.bf16.vlgmr.msra.gmra.mxu1 %vm578_vm7, %v668_v11  ;;  %v664_v17 = vmul.f32 %v3191_v15, %v3175_v42  ;;  %v3193_v18 = vpop.eup %3192 }
 0x441   :  { %2847 = vmatpush3.bf16.msra.mxu1 %v3068_v50  ;;  %v665_v24 = vmul.f32 %v3193_v18, %v3177_v43 }
 0x442   :  { %v669_v22 = vpack.c.bf16 %v664_v17, %v663_v16  ;;  %2848 = vmatprep.subr.bf16.mxu1 %v3069_v14 }
 0x443   :  { %v3195_v23 = vpop.eup %3194 }
 0x444   :  { %2842 = vmatprep.mubr.msk.bf16.mxu1 %vm578_vm7, %v669_v22  ;;  %v666_v25 = vmul.f32 %v3195_v23, %v3179_v48 }
 0x445   :  { %2849 = vmatpush3.bf16.msra.mxu1 %v3069_v14 }
 0x446   :  { %v670_v21 = vpack.c.bf16 %v666_v25, %v665_v24  ;;  %2850 = vmatprep.subr.bf16.mxu1 %v3070_v12 }
 0x448   :  { %2843 = vmatmul.mubr.msk.bf16.gmra.mxu1 %vm578_vm7, %v670_v21 }
 0x449   :  { %2851 = vmatpush3.bf16.msra.mxu1 %v3070_v12 }
 0x44a   :  { %2852 = vmatprep.subr.bf16.mxu1 %v3071_v32 }
 0x44d   :  { %2853 = vmatpush3.bf16.msra.mxu1 %v3071_v32 }
 0x44e   :  { %2854 = vmatprep.subr.bf16.mxu1 %v3072_v33 }
 0x451   :  { %2855 = vmatpush3.bf16.msra.mxu1 %v3072_v33 }
 0x452   :  { %2856 = vmatprep.subr.bf16.mxu1 %v3073_v35 }
 0x455   :  { %2857 = vmatpush3.bf16.msra.mxu1 %v3073_v35 }
 0x456   :  { %2858 = vmatprep.subr.bf16.mxu1 %v3074_v36 }
 0x459   :  { %2859 = vmatpush3.bf16.msra.mxu1 %v3074_v36 }
 0x45a   :  { %2860 = vmatprep.subr.bf16.mxu1 %v3075_v37 }
 0x45d   :  { %2861 = vmatpush3.bf16.msra.mxu1 %v3075_v37 }
 0x500   :  { %v2840_v38 = vpop.f32.mrf.mxu1 }
 0x501   :  { %v750_v54 = vmul.f32 %v2840_v38, %v3544_v34 }
 0x502   :  { %v717_v39 = vpop.f32.mrf.mxu1 }
 0x503   :  { %v748_v51 = vmul.f32 %v3544_v34, %v717_v39 }
 0x504   :  { %v2841_v7 = vpop.f32.mrf.mxu1 }
 0x505   :  { %v751_v48 = vmul.f32 %v2841_v7, %v3544_v34 }
 0x506   :  { %v720_v40 = vpop.f32.mrf.mxu1 }
 0x507   :  { %v749_v52 = vmul.f32 %v3544_v34, %v720_v40 }
 0x508   :  { %v2844_v41 = vpop.f32.mrf.mxu1 }
 0x509   :  { %v754_v49 = vmul.f32 %v2844_v41, %v3559_v8 }
 0x50a   :  { %v733_v42 = vpop.f32.mrf.mxu1 }
 0x50b   :  { %v752_v44 = vmul.f32 %v3559_v8, %v733_v42  ;;  %v758_v58 = vadd.f32 %v754_v49, %v750_v54  ;;  %v3076_v42 = vld [vmem:[%s4003_s5 + $0x38] sm:$0xff]   ;;  %v3081_v49 = vld [vmem:[%s4003_s5 + $0x10] sm:$0xff]  }
 0x50c   :  { %v2845_v43 = vpop.f32.mrf.mxu1  ;;  %2866 = vmatprep.subr.bf16.mxu0 %v3076_v42 }
 0x50d   :  { %v755_v46 = vmul.f32 %v2845_v43, %v3559_v8  ;;  %v756_v56 = vadd.f32 %v752_v44, %v748_v51  ;;  %2867 = vmatpush3.bf16.msra.mxu0 %v3076_v42  ;;  %v3077_v43 = vld [vmem:[%s4003_s5 + $0x30] sm:$0xff]   ;;  %v3078_v44 = vld [vmem:[%s4003_s5 + $0x28] sm:$0xff]   ;;  %v3083_v51 = vld [vmem:[%s4003_s5] sm:$0xff]  }
 0x50e   :  { %v736_v50 = vpop.f32.mrf.mxu1  ;;  %2868 = vmatprep.subr.bf16.mxu0 %v3077_v43 }
 0x50f   :  { %v753_v53 = vmul.f32 %v3559_v8, %v736_v50  ;;  %v759_v55 = vadd.f32 %v755_v46, %v751_v48  ;;  %v3079_v46 = vld [vmem:[%s4003_s5 + $0x20] sm:$0xff]   ;;  %v3080_v48 = vld [vmem:[%s4003_s5 + $0x18] sm:$0xff]   ;;  %v3082_v50 = vld [vmem:[%s4003_s5 + $0x8] sm:$0xff]  }
 0x511   :  { %v757_v57 = vadd.f32 %v753_v53, %v749_v52  ;;  %v761_v60 = vpack.c.bf16 %v759_v55, %v758_v58  ;;  %2869 = vmatpush3.bf16.msra.mxu0 %v3077_v43 }
 0x512   :  { %2870 = vmatprep.subr.bf16.mxu0 %v3078_v44 }
 0x513   :  { %v760_v59 = vpack.c.bf16 %v757_v57, %v756_v56 }
 0x515   :  { %2862 = vmatprep.mubr.bf16.mxu1 %v760_v59  ;;  %2871 = vmatpush3.bf16.msra.mxu0 %v3078_v44 }
 0x516   :  { %2863 = vmatmul.mubr.bf16.vlgmr.msra.gmra.mxu1 %v761_v60  ;;  %2872 = vmatprep.subr.bf16.mxu0 %v3079_v46 }
 0x519   :  { %2873 = vmatpush3.bf16.msra.mxu0 %v3079_v46 }
 0x51a   :  { %2874 = vmatprep.subr.bf16.mxu0 %v3080_v48 }
 0x51d   :  { %2875 = vmatpush3.bf16.msra.mxu0 %v3080_v48 }
 0x51e   :  { %2876 = vmatprep.subr.bf16.mxu0 %v3081_v49 }
 0x521   :  { %2877 = vmatpush3.bf16.msra.mxu0 %v3081_v49 }
 0x522   :  { %2878 = vmatprep.subr.bf16.mxu0 %v3082_v50 }
 0x525   :  { %2879 = vmatpush3.bf16.msra.mxu0 %v3082_v50 }
 0x526   :  { %2880 = vmatprep.subr.bf16.mxu0 %v3083_v51 }
 0x529   :  { %2881 = vmatpush3.bf16.msra.mxu0 %v3083_v51 }
 0x5d6   :  { %v2864_v62 = vpop.f32.mrf.mxu1 }
 0x5d7   :  { %v873_v6 = vadd.f32 %v2864_v62, %v781_v63 }
 0x5d8   :  { %v864_v0 = vpop.f32.mrf.mxu1 }
 0x5d9   :  { %v865_v4 = vadd.f32 %v864_v0, %v781_v63  ;;  %v881_v17 = vadd.f32 %v873_v6, %v3525_v26 }
 0x5da   :  { %v2865_v5 = vpop.f32.mrf.mxu1 }
 0x5db   :  { %v879_v10 = vadd.f32 %v865_v4, %v3518_v19  ;;  %v876_v15 = vadd.f32 %v2865_v5, %v781_v63  ;;  %v933_v4 = vsub.s32 7, %v3498_v1 }
 0x5dc   :  { %v867_v11 = vpop.f32.mrf.mxu1 }
 0x5dd   :  { %v868_v14 = vadd.f32 %v867_v11, %v781_v63  ;;  %883 = vadd.xlane.f32.xlu0 %v879_v10  ;;  %v882_v18 = vadd.f32 %v876_v15, %v3527_v28  ;;  %v3683_v11 = vld [vmem:[%s4000_s2 + $0x8] sm:$0xff] }
 0x5df   :  { %v880_v16 = vadd.f32 %v868_v14, %v3520_v20 }
 0x5e1   :  { %885 = vadd.xlane.f32.xlu1 %v880_v16  ;;  %887 = vadd.xlane.f32.xlu0 %v881_v17 }
 0x5e5   :  { %889 = vadd.xlane.f32.xlu1 %v882_v18 }
 0x666   :  { %v884_v22 = vpop.xlane.xlu0 %883 }
 0x667   :  { %v891_v12 = vmul.f32 0.015625, %v884_v22 }
 0x669   :  { %v895_v23 = vsub.f32 %v879_v10, %v891_v12  ;;  %v934_v10 = vrot.slane %v3506_v3, %v933_v4 }
 0x66a   :  { %v886_v24 = vpop.xlane.xlu1 %885  ;;  %v888_v25 = vpop.xlane.xlu0 %887 }
 0x66b   :  { %v892_v21 = vmul.f32 0.015625, %v886_v24  ;;  %v893_v19 = vmul.f32 0.015625, %v888_v25  ;;  %v899_v32 = vmul.f32 %v3408_v13, %v895_v23 }
 0x66d   :  { %v896_v33 = vsub.f32 %v880_v16, %v892_v21  ;;  %v897_v35 = vsub.f32 %v881_v17, %v893_v19  ;;  %v903_v36 = vmul.f32 %v899_v32, %v899_v32 }
 0x66e   :  { %v890_v20 = vpop.xlane.xlu1 %889 }
 0x66f   :  { %v894_v37 = vmul.f32 0.015625, %v890_v20  ;;  %907 = vadd.xlane.f32.xlu0 %v903_v36  ;;  %v900_v26 = vmul.f32 %v3408_v13, %v896_v33  ;;  %v901_v28 = vmul.f32 %v3408_v13, %v897_v35  ;;  %v3084_v20 = vld [vmem:[#allocation2 + $0x38] sm:$0xff]  }
 0x670   :  { %2886 = vmatprep.subr.bf16.mxu1 %v3084_v20 }
 0x671   :  { %v898_v38 = vsub.f32 %v882_v18, %v894_v37  ;;  %v904_v39 = vmul.f32 %v900_v26, %v900_v26  ;;  %v905_v7 = vmul.f32 %v901_v28, %v901_v28  ;;  %v942_v18 = vrot.slane %v3683_v11, %v3501_v2  ;;  %2887 = vmatpush3.bf16.msra.mxu1 %v3084_v20  ;;  %v3085_v37 = vld [vmem:[#allocation2 + $0x30] sm:$0xff]  }
 0x672   :  { %2888 = vmatprep.subr.bf16.mxu1 %v3085_v37 }
 0x673   :  { %909 = vadd.xlane.f32.xlu1 %v904_v39  ;;  %911 = vadd.xlane.f32.xlu0 %v905_v7  ;;  %v902_v40 = vmul.f32 %v3408_v13, %v898_v38  ;;  %v3088_v38 = vld [vmem:[#allocation2 + $0x18] sm:$0xff]   ;;  %v3089_v39 = vld [vmem:[#allocation2 + $0x10] sm:$0xff]   ;;  %v3090_v7 = vld [vmem:[#allocation2 + $0x8] sm:$0xff]  }
 0x675   :  { %v906_v41 = vmul.f32 %v902_v40, %v902_v40  ;;  %2889 = vmatpush3.bf16.msra.mxu1 %v3085_v37 }
 0x677   :  { %913 = vadd.xlane.f32.xlu1 %v906_v41  ;;  %v968_v41 = vrot.slane %v3683_v11, %v3512_v9 }
 0x6f8   :  { %v908_v52 = vpop.xlane.xlu0 %907 }
 0x6f9   :  { %v915_v53 = vmul.f32 0.015625, %v908_v52 }
 0x6fb   :  { %v919_v54 = vadd.f32 1e-12, %v915_v53 }
 0x6fc   :  { %v910_v55 = vpop.xlane.xlu1 %909  ;;  %v912_v56 = vpop.xlane.xlu0 %911 }
 0x6fd   :  { %3196 = vrsqrt.f32 %v919_v54  ;;  %v916_v57 = vmul.f32 0.015625, %v910_v55  ;;  %v917_v58 = vmul.f32 0.015625, %v912_v56 }
 0x6ff   :  { %v920_v59 = vadd.f32 1e-12, %v916_v57  ;;  %v921_v60 = vadd.f32 1e-12, %v917_v58 }
 0x700   :  { %v914_v62 = vpop.xlane.xlu1 %913 }
 0x701   :  { %3198 = vrsqrt.f32 %v920_v59  ;;  %v918_v63 = vmul.f32 0.015625, %v914_v62 }
 0x702   :  { %3200 = vrsqrt.f32 %v921_v60 }
 0x703   :  { %v922_v0 = vadd.f32 1e-12, %v918_v63 }
 0x705   :  { %3202 = vrsqrt.f32 %v922_v0 }
 0x70a   :  { %v3197_v5 = vpop.eup %3196 }
 0x70b   :  { %v927_v6 = vmul.f32 %v3197_v5, %v899_v32 }
 0x70d   :  { %v935_v17 = vmul.f32 %v934_v10, %v927_v6 }
 0x70e   :  { %v3199_v14 = vpop.eup %3198 }
 0x70f   :  { %v3201_v15 = vpop.eup %3200  ;;  %v928_v16 = vmul.f32 %v3199_v14, %v900_v26  ;;  %v3687_v25 = vadd.f32 %v942_v18, %v935_v17  ;;  %v3086_v26 = vld [vmem:[#allocation2 + $0x28] sm:$0xff]  }
 0x710   :  { %v929_v22 = vmul.f32 %v3201_v15, %v901_v28  ;;  %2890 = vmatprep.subr.bf16.mxu1 %v3086_v26  ;;  %v3087_v28 = vld [vmem:[#allocation2 + $0x20] sm:$0xff]  }
 0x711   :  { %v936_v12 = vmul.f32 %v934_v10, %v928_v16  ;;  %2891 = vmatpush3.bf16.msra.mxu1 %v3086_v26 }
 0x712   :  { %v3203_v23 = vpop.eup %3202  ;;  %v937_v3 = vmul.f32 %v934_v10, %v929_v22  ;;  %2892 = vmatprep.subr.bf16.mxu1 %v3087_v28 }
 0x713   :  { %v930_v24 = vmul.f32 %v3203_v23, %v902_v40  ;;  %v3689_v21 = vadd.f32 %v942_v18, %v936_v12  ;;  %v3091_v40 = vld [vmem:[#allocation2] sm:$0xff]  }
 0x714   :  { %v3693_v33 = vadd.f32 %v942_v18, %v937_v3 }
 0x715   :  { %v947_v19 = vpack.c.bf16 %v3689_v21, %v3687_v25  ;;  %v938_v32 = vmul.f32 %v934_v10, %v930_v24  ;;  %2893 = vmatpush3.bf16.msra.mxu1 %v3087_v28 }
 0x716   :  { %2894 = vmatprep.subr.bf16.mxu1 %v3088_v38 }
 0x717   :  { %2882 = vmatprep.mubr.bf16.mxu0 %v947_v19  ;;  %v3695_v35 = vadd.f32 %v942_v18, %v938_v32 }
 0x719   :  { %v948_v36 = vpack.c.bf16 %v3695_v35, %v3693_v33  ;;  %2895 = vmatpush3.bf16.msra.mxu1 %v3088_v38 }
 0x71a   :  { %2896 = vmatprep.subr.bf16.mxu1 %v3089_v39 }
 0x71b   :  { %2883 = vmatmul.mubr.bf16.vlgmr.msra.gmra.mxu0 %v948_v36 }
 0x71c   :  { %1484 = vmatprep.mubr.bf16.mxu0 %v3326_v47 }
 0x71d   :  { %2897 = vmatpush3.bf16.msra.mxu1 %v3089_v39 }
 0x71e   :  { %2898 = vmatprep.subr.bf16.mxu1 %v3090_v7 }
 0x721   :  { %2899 = vmatpush3.bf16.msra.mxu1 %v3090_v7 }
 0x722   :  { %2900 = vmatprep.subr.bf16.mxu1 %v3091_v40 }
 0x725   :  { %2901 = vmatpush3.bf16.msra.mxu1 %v3091_v40 }
 0x7db   :  { %v2884_v42 = vpop.f32.mrf.mxu0 }
 0x7dc   :  { %v1060_v43 = vadd.f32 %v2884_v42, %v968_v41 }
 0x7dd   :  { %v1051_v44 = vpop.f32.mrf.mxu0 }
 0x7de   :  { %v1072_v46 = vmul.f32 0.044715, %v1060_v43  ;;  %v1052_v48 = vadd.f32 %v1051_v44, %v968_v41  ;;  %v1068_v28 = vmul.f32 0.5, %v1060_v43  ;;  %v3703_v44 = vsub.s32 2, %v3498_v1 }
 0x7df   :  { %v2885_v49 = vpop.f32.mrf.mxu0 }
 0x7e0   :  { %v1076_v50 = vmul.f32 %v1072_v46, %v1060_v43  ;;  %v1070_v51 = vmul.f32 0.044715, %v1052_v48  ;;  %v1063_v52 = vadd.f32 %v2885_v49, %v968_v41  ;;  %v1066_v20 = vmul.f32 0.5, %v1052_v48 }
 0x7e1   :  { %v1054_v53 = vpop.f32.mrf.mxu0  ;;  %v1123_v49 = vrot.slane %v3683_v11, %v3703_v44 }
 0x7e2   :  { %v1080_v54 = vmul.f32 %v1076_v50, %v1060_v43  ;;  %v1074_v55 = vmul.f32 %v1070_v51, %v1052_v48  ;;  %v1073_v56 = vmul.f32 0.044715, %v1063_v52  ;;  %v1055_v57 = vadd.f32 %v1054_v53, %v968_v41 }
 0x7e3   :  { %v1069_v32 = vmul.f32 0.5, %v1063_v52 }
 0x7e4   :  { %v1084_v58 = vadd.f32 %v1080_v54, %v1060_v43  ;;  %v1078_v59 = vmul.f32 %v1074_v55, %v1052_v48  ;;  %v1077_v60 = vmul.f32 %v1073_v56, %v1063_v52  ;;  %v1071_v62 = vmul.f32 0.044715, %v1055_v57 }
 0x7e5   :  { %v1067_v37 = vmul.f32 0.5, %v1055_v57 }
 0x7e6   :  { %v1081_v63 = vmul.f32 %v1077_v60, %v1063_v52  ;;  %v1075_v0 = vmul.f32 %v1071_v62, %v1055_v57  ;;  %v1082_v5 = vadd.f32 %v1078_v59, %v1052_v48  ;;  %v1088_v6 = vmul.f32 0.7978846, %v1084_v58  ;;  %v3092_v59 = vld [vmem:[%s4001_s3 + $0x168] ss:$12 sps:$4 sm:$0xff]  }
 0x7e8   :  { %v1085_v10 = vadd.f32 %v1081_v63, %v1063_v52  ;;  %v1079_v14 = vmul.f32 %v1075_v0, %v1055_v57  ;;  %v1086_v15 = vmul.f32 0.7978846, %v1082_v5 }
 0x7ea   :  { %v1089_v16 = vmul.f32 0.7978846, %v1085_v10  ;;  %v1083_v17 = vadd.f32 %v1079_v14, %v1055_v57  ;;  %3204 = vtanh.f32 %v1086_v15 }
 0x7eb   :  { %3206 = vtanh.f32 %v1088_v6 }
 0x7ec   :  { %3208 = vtanh.f32 %v1089_v16  ;;  %v1087_v18 = vmul.f32 0.7978846, %v1083_v17 }
 0x7ee   :  { %3210 = vtanh.f32 %v1087_v18 }
 0x7f7   :  { %v3205_v22 = vpop.eup %3204 }
 0x7f8   :  { %v3207_v12 = vpop.eup %3206  ;;  %v1094_v24 = vadd.f32 1.0, %v3205_v22 }
 0x7f9   :  { %v3209_v23 = vpop.eup %3208  ;;  %v1096_v36 = vadd.f32 1.0, %v3207_v12 }
 0x7fa   :  { %v1097_v3 = vadd.f32 1.0, %v3209_v23  ;;  %v1098_v39 = vmul.f32 %v1094_v24, %v1066_v20  ;;  %v3101_v20 = vld [vmem:[%s4001_s3 + $0x13c] ss:$12 sps:$4 sm:$0xff]  }
 0x7fb   :  { %v3211_v19 = vpop.eup %3210  ;;  %v1100_v40 = vmul.f32 %v1096_v36, %v1068_v28  ;;  %v3095_v36 = vld [vmem:[%s4001_s3 + $0x150] ss:$12 sps:$4 sm:$0xff]  }
 0x7fc   :  { %v1095_v26 = vadd.f32 1.0, %v3211_v19  ;;  %v1101_v38 = vmul.f32 %v1097_v3, %v1069_v32  ;;  %v3097_v19 = vld [vmem:[%s4001_s3 + $0x154] ss:$12 sps:$4 sm:$0xff]   ;;  %v3098_v32 = vld [vmem:[%s4001_s3 + $0x170] ss:$12 sps:$4 sm:$0xff]  }
 0x7fd   :  { %2906 = vmatprep.subr.bf16.mxu1 %v3098_v32  ;;  %v3105_v28 = vld [vmem:[%s4001_s3 + $0x124] ss:$12 sps:$4 sm:$0xff]  }
 0x7fe   :  { %v1099_v7 = vmul.f32 %v1095_v26, %v1067_v37  ;;  %v1103_v42 = vpack.c.bf16 %v1101_v38, %v1100_v40  ;;  %v3102_v37 = vld [vmem:[%s4001_s3 + $0x158] ss:$12 sps:$4 sm:$0xff]   ;;  %v3106_v38 = vld [vmem:[%s4001_s3 + $0x140] ss:$12 sps:$4 sm:$0xff]  }
 0x7ff   :  { %v3099_v26 = vld [vmem:[%s4001_s3 + $0x138] ss:$12 sps:$4 sm:$0xff]  }
 0x800   :  { %v1102_v41 = vpack.c.bf16 %v1099_v7, %v1098_v39  ;;  %v3103_v39 = vld [vmem:[%s4001_s3 + $0x120] ss:$12 sps:$4 sm:$0xff]   ;;  %v3107_v7 = vld [vmem:[%s4001_s3 + $0x108] ss:$12 sps:$4 sm:$0xff]  }
 0x801   :  { %v3109_v40 = vld [vmem:[%s4001_s3 + $0x10c] ss:$12 sps:$4 sm:$0xff]  }
 0x802   :  { %2902 = vmatprep.mubr.bf16.mxu1 %v1102_v41  ;;  %v3110_v41 = vld [vmem:[%s4001_s3 + $0x128] ss:$12 sps:$4 sm:$0xff]  }
 0x803   :  { %2903 = vmatmul.mubr.bf16.vlgmr.msra.gmra.mxu1 %v1103_v42  ;;  %v3113_v42 = vld [vmem:[%s4001_s3 + $0xf4] ss:$12 sps:$4 sm:$0xff]  }
 0x804   :  { %2907 = vmatpush3.bf16.msra.mxu1 %v3098_v32 }
 0x805   :  { %2908 = vmatprep.subr.bf16.mxu1 %v3102_v37 }
 0x808   :  { %2909 = vmatpush3.bf16.msra.mxu1 %v3102_v37 }
 0x809   :  { %2910 = vmatprep.subr.bf16.mxu1 %v3106_v38 }
 0x80c   :  { %2911 = vmatpush3.bf16.msra.mxu1 %v3106_v38 }
 0x80d   :  { %2912 = vmatprep.subr.bf16.mxu1 %v3110_v41 }
 0x810   :  { %2913 = vmatpush3.bf16.msra.mxu1 %v3110_v41 }
 0x8c3   :  { %v2904_v46 = vpop.f32.mrf.mxu1 }
 0x8c4   :  { %v1215_v52 = vadd.f32 %v2904_v46, %v1123_v49  ;;  %v3114_v46 = vld [vmem:[%s4001_s3 + $0x110] ss:$12 sps:$4 sm:$0xff]  }
 0x8c5   :  { %v1206_v50 = vpop.f32.mrf.mxu1  ;;  %2914 = vmatprep.subr.bf16.mxu1 %v3114_v46 }
 0x8c6   :  { %v1207_v48 = vadd.f32 %v1206_v50, %v1123_v49  ;;  %v1223_v57 = vadd.f32 %v1215_v52, %v3693_v33  ;;  %v3117_v50 = vld [vmem:[%s4001_s3 + $0xdc] ss:$12 sps:$4 sm:$0xff]   ;;  %2915 = vmatpush3.bf16.msra.mxu1 %v3114_v46  ;;  %v3121_v52 = vld [vmem:[%s4001_s3 + $0xc4] ss:$12 sps:$4 sm:$0xff]  }
 0x8c7   :  { %v2905_v51 = vpop.f32.mrf.mxu1 }
 0x8c8   :  { %v1221_v43 = vadd.f32 %v1207_v48, %v3687_v25  ;;  %v1218_v55 = vadd.f32 %v2905_v51, %v1123_v49  ;;  %v3094_v25 = vld [vmem:[%s4001_s3 + $0x16c] ss:$12 sps:$4 sm:$0xff]  }
 0x8c9   :  { %v1209_v53 = vpop.f32.mrf.mxu1  ;;  %1452 = vmatprep.subr.bf16.mxu0 %v3094_v25  ;;  %v3118_v48 = vld [vmem:[%s4001_s3 + $0xf8] ss:$12 sps:$4 sm:$0xff]  }
 0x8ca   :  { %v1210_v54 = vadd.f32 %v1209_v53, %v1123_v49  ;;  %1225 = vadd.xlane.f32.xlu0 %v1221_v43  ;;  %v1224_v58 = vadd.f32 %v1218_v55, %v3695_v35  ;;  %1453 = vmatpush1.bf16.msra.mxu0 %v3092_v59  ;;  %v3111_v49 = vld [vmem:[%s4001_s3 + $0xf0] ss:$12 sps:$4 sm:$0xff]   ;;  %v3115_v51 = vld [vmem:[%s4001_s3 + $0xd8] ss:$12 sps:$4 sm:$0xff]   ;;  %v3119_v53 = vld [vmem:[%s4001_s3 + $0xc0] ss:$12 sps:$4 sm:$0xff]  }
 0x8cb   :  { %1454 = vmatprep.subr.bf16.mxu0 %v3097_v19  ;;  %2916 = vmatprep.subr.bf16.mxu1 %v3118_v48 }
 0x8cc   :  { %v1222_v56 = vadd.f32 %v1210_v54, %v3689_v21  ;;  %2917 = vmatpush3.bf16.msra.mxu1 %v3118_v48  ;;  %v3123_v54 = vld [vmem:[%s4001_s3 + $0xc8] ss:$12 sps:$4 sm:$0xff]  }
 0x8ce   :  { %1227 = vadd.xlane.f32.xlu1 %v1222_v56  ;;  %1229 = vadd.xlane.f32.xlu0 %v1223_v57 }
 0x8cf   :  { %1455 = vmatpush1.bf16.msra.mxu0 %v3095_v36 }
 0x8d0   :  { %1456 = vmatprep.subr.bf16.mxu0 %v3101_v20 }
 0x8d2   :  { %1231 = vadd.xlane.f32.xlu1 %v1224_v58 }
 0x8d3   :  { %1457 = vmatpush1.bf16.msra.mxu0 %v3099_v26 }
 0x8d4   :  { %1458 = vmatprep.subr.bf16.mxu0 %v3105_v28 }
 0x8d7   :  { %1459 = vmatpush1.bf16.msra.mxu0 %v3103_v39 }
 0x8d8   :  { %1460 = vmatprep.subr.bf16.mxu0 %v3109_v40 }
 0x8db   :  { %1461 = vmatpush1.bf16.msra.mxu0 %v3107_v7 }
 0x8dc   :  { %1462 = vmatprep.subr.bf16.mxu0 %v3113_v42 }
 0x8df   :  { %1463 = vmatpush1.bf16.msra.mxu0 %v3111_v49 }
 0x8e0   :  { %1464 = vmatprep.subr.bf16.mxu0 %v3117_v50 }
 0x8e3   :  { %1465 = vmatpush1.bf16.msra.mxu0 %v3115_v51 }
 0x8e4   :  { %1466 = vmatprep.subr.bf16.mxu0 %v3121_v52 }
 0x8e7   :  { %1467 = vmatpush1.bf16.msra.mxu0 %v3119_v53 }
 0x953   :  { %v1226_v60 = vpop.xlane.xlu0 %1225 }
 0x954   :  { %v1233_v62 = vmul.f32 0.015625, %v1226_v60 }
 0x956   :  { %v1237_v21 = vsub.f32 %v1221_v43, %v1233_v62  ;;  %v3122_v43 = vld [vmem:[%s4001_s3 + $0xe0] ss:$12 sps:$4 sm:$0xff]  }
 0x957   :  { %v1228_v63 = vpop.xlane.xlu1 %1227  ;;  %v1230_v33 = vpop.xlane.xlu0 %1229  ;;  %2918 = vmatprep.subr.bf16.mxu1 %v3122_v43 }
 0x958   :  { %v1234_v0 = vmul.f32 0.015625, %v1228_v63  ;;  %v1235_v5 = vmul.f32 0.015625, %v1230_v33  ;;  %v3718_v35 = vmul.f32 %v3408_v13, %v1237_v21  ;;  %2919 = vmatpush3.bf16.msra.mxu1 %v3122_v43  ;;  %v1565_v43 = vrot.slane %v3683_v11, %v3640_v61 }
 0x959   :  { %2920 = vmatprep.subr.bf16.mxu1 %v3123_v54 }
 0x95a   :  { %v1238_v6 = vsub.f32 %v1222_v56, %v1234_v0  ;;  %v1239_v10 = vsub.f32 %v1223_v57, %v1235_v5  ;;  %v1245_v14 = vmul.f32 %v3718_v35, %v3718_v35 }
 0x95b   :  { %v1232_v15 = vpop.xlane.xlu1 %1231 }
 0x95c   :  { %v1236_v16 = vmul.f32 0.015625, %v1232_v15  ;;  %1249 = vadd.xlane.f32.xlu0 %v1245_v14  ;;  %v3723_v17 = vmul.f32 %v3408_v13, %v1238_v6  ;;  %v3726_v18 = vmul.f32 %v3408_v13, %v1239_v10  ;;  %2921 = vmatpush3.bf16.msra.mxu1 %v3123_v54  ;;  %v1276_v6 = vrot.slane %v3683_v11, %v3533_v27 }
 0x95e   :  { %v1240_v22 = vsub.f32 %v1224_v58, %v1236_v16  ;;  %v1246_v12 = vmul.f32 %v3723_v17, %v3723_v17  ;;  %v1247_v23 = vmul.f32 %v3726_v18, %v3726_v18 }
 0x960   :  { %1251 = vadd.xlane.f32.xlu1 %v1246_v12  ;;  %1253 = vadd.xlane.f32.xlu0 %v1247_v23  ;;  %v3733_v24 = vmul.f32 %v3408_v13, %v1240_v22  ;;  %v1284_v12 = vrot.slane %v3683_v11, %v3551_v45 }
 0x962   :  { %v1248_v3 = vmul.f32 %v3733_v24, %v3733_v24 }
 0x964   :  { %1255 = vadd.xlane.f32.xlu1 %v1248_v3 }
 0x9e5   :  { %v1250_v55 = vpop.xlane.xlu0 %1249 }
 0x9e6   :  { %v1257_v56 = vmul.f32 0.015625, %v1250_v55 }
 0x9e8   :  { %v1261_v57 = vadd.f32 1e-12, %v1257_v56 }
 0x9e9   :  { %v1252_v58 = vpop.xlane.xlu1 %1251  ;;  %v1254_v59 = vpop.xlane.xlu0 %1253 }
 0x9ea   :  { %3212 = vrsqrt.f32 %v1261_v57  ;;  %v1258_v25 = vmul.f32 0.015625, %v1252_v58  ;;  %v1259_v60 = vmul.f32 0.015625, %v1254_v59 }
 0x9ec   :  { %v1262_v62 = vadd.f32 1e-12, %v1258_v25  ;;  %v1263_v21 = vadd.f32 1e-12, %v1259_v60 }
 0x9ed   :  { %v1256_v63 = vpop.xlane.xlu1 %1255 }
 0x9ee   :  { %3214 = vrsqrt.f32 %v1262_v62  ;;  %v1260_v33 = vmul.f32 0.015625, %v1256_v63  ;;  %v1575_v62 = vrot.slane %v3683_v11, %v933_v4 }
 0x9ef   :  { %3216 = vrsqrt.f32 %v1263_v21 }
 0x9f0   :  { %v1264_v0 = vadd.f32 1e-12, %v1260_v33 }
 0x9f2   :  { %3218 = vrsqrt.f32 %v1264_v0 }
 0x9f7   :  { %v3213_v5 = vpop.eup %3212 }
 0x9f8   :  { %v1269_v10 = vmul.f32 %v3213_v5, %v3718_v35 }
 0x9fa   :  { %v1277_v22 = vmul.f32 %v1276_v6, %v1269_v10 }
 0x9fb   :  { %v3215_v14 = vpop.eup %3214 }
 0x9fc   :  { %v3217_v15 = vpop.eup %3216  ;;  %v1270_v16 = vmul.f32 %v3215_v14, %v3723_v17  ;;  %v3810_v32 = vadd.f32 %v1284_v12, %v1277_v22 }
 0x9fd   :  { %v1271_v23 = vmul.f32 %v3217_v15, %v3726_v18 }
 0x9fe   :  { %v1278_v3 = vmul.f32 %v1276_v6, %v1270_v16 }
 0x9ff   :  { %v3219_v19 = vpop.eup %3218  ;;  %v1279_v37 = vmul.f32 %v1276_v6, %v1271_v23 }
 0xa00   :  { %v3812_v36 = vadd.f32 %v1284_v12, %v1278_v3  ;;  %v1272_v20 = vmul.f32 %v3219_v19, %v3733_v24  ;;  %v1557_v24 = vrot.slane %v3683_v11, %v3539_v31 }
 0xa01   :  { %v3817_v17 = vadd.f32 %v1284_v12, %v1279_v37 }
 0xa02   :  { %v1289_v35 = vpack.c.bf16 %v3812_v36, %v3810_v32  ;;  %v1280_v26 = vmul.f32 %v1276_v6, %v1272_v20 }
 0xa04   :  { %1485 = vmatmul.mubr.bf16.vlgmr.msra.gmra.mxu0 %v1289_v35  ;;  %2922 = vmatprep.mubr.bf16.mxu1 %v1289_v35  ;;  %v3819_v28 = vadd.f32 %v1284_v12, %v1280_v26 }
 0xa05   :  { %1494 = vmatprep.mubr.bf16.mxu0 %v3326_v47 }
 0xa06   :  { %v1290_v18 = vpack.c.bf16 %v3819_v28, %v3817_v17 }
 0xa08   :  { %2923 = vmatmul.mubr.bf16.vlgmr.msra.gmra.mxu1 %v1290_v18 }
 0xa0c   :  { %1495 = vmatmul.mubr.bf16.gmra.mxu0 %v1290_v18 }
 0xac4   :  { %v1486_v38 = vpop.f32.mrf.mxu0 }
 0xac5   :  { %v1558_v7 = vadd.f32 %v1557_v24, %v1486_v38 }
 0xac6   :  { %v1488_v39 = vpop.f32.mrf.mxu0 }
 0xac7   :  { %v1582_v46 = vmul.f32 %v3544_v34, %v1558_v7  ;;  %v1566_v58 = vadd.f32 %v1565_v43, %v1488_v39  ;;  %v1586_v1 = vmul.f32 %v3559_v8, %v1558_v7 }
 0xac8   :  { %v1490_v40 = vpop.f32.mrf.mxu0  ;;  %v2924_v51 = vpop.f32.mrf.mxu1 }
 0xac9   :  { %v1559_v41 = vadd.f32 %v1557_v24, %v1490_v40  ;;  %v1578_v63 = vadd.f32 %v2924_v51, %v1575_v62 }
 0xaca   :  { %v1492_v42 = vpop.f32.mrf.mxu0  ;;  %v1539_v57 = vpop.f32.mrf.mxu1 }
 0xacb   :  { %v1583_v49 = vmul.f32 %v3544_v34, %v1559_v41  ;;  %v1567_v54 = vadd.f32 %v1565_v43, %v1492_v42  ;;  %v1587_v14 = vmul.f32 %v3559_v8, %v1559_v41  ;;  %v1576_v22 = vadd.f32 %v1575_v62, %v1539_v57 }
 0xacc   :  { %v1496_v50 = vpop.f32.mrf.mxu0  ;;  %v2925_v60 = vpop.f32.mrf.mxu1 }
 0xacd   :  { %v1590_v47 = vpack.c.bf16 %v1583_v49, %v1582_v46  ;;  %v1570_v25 = vpack.c.bf16 %v1567_v54, %v1566_v58  ;;  %v1579_v21 = vadd.f32 %v2925_v60, %v1575_v62  ;;  %v1560_v0 = vadd.f32 %v1557_v24, %v1496_v50 }
 0xace   :  { %v1498_v48 = vpop.f32.mrf.mxu0  ;;  %v1542_v6 = vpop.f32.mrf.mxu1  ;;  %v1592_v11 = vpack.c.bf16 %v1587_v14, %v1586_v1 }
 0xacf   :  { %2930 = vmatprep.mubr.bf16.mxu0 %v1590_v47  ;;  %v1568_v55 = vadd.f32 %v1565_v43, %v1498_v48  ;;  %v1581_v5 = vpack.c.bf16 %v1579_v21, %v1578_v63  ;;  %v1584_v15 = vmul.f32 %v3544_v34, %v1560_v0  ;;  %v1577_v16 = vadd.f32 %v1575_v62, %v1542_v6 }
 0xad0   :  { %v1500_v52 = vpop.f32.mrf.mxu0  ;;  %v1588_v3 = vmul.f32 %v3559_v8, %v1560_v0 }
 0xad1   :  { %v1561_v33 = vadd.f32 %v1557_v24, %v1500_v52  ;;  %v1580_v12 = vpack.c.bf16 %v1577_v16, %v1576_v22 }
 0xad2   :  { %v1502_v53 = vpop.f32.mrf.mxu0 }
 0xad3   :  { %v1569_v56 = vadd.f32 %v1565_v43, %v1502_v53  ;;  %v1585_v10 = vmul.f32 %v3544_v34, %v1561_v33  ;;  %v1589_v23 = vmul.f32 %v3559_v8, %v1561_v33 }
 0xad5   :  { %v1571_v59 = vpack.c.bf16 %v1569_v56, %v1568_v55  ;;  %v1591_v4 = vpack.c.bf16 %v1585_v10, %v1584_v15  ;;  %v1593_v19 = vpack.c.bf16 %v1589_v23, %v1588_v3 }
 0xad7   :  { %2926 = vmatprep.subr.bf16.mxu0 %v1571_v59 }
 0xad8   :  { %2927 = vmatpush3.bf16.xpose.msra.mxu0 %v1571_v59 }
 0xad9   :  { %2928 = vmatprep.subr.bf16.mxu0 %v1570_v25 }
 0xae0   :  { %2929 = vmatpush3.bf16.xpose.msra.mxu0 %v1570_v25 }
 0xae1   :  { %2938 = vmatprep.subr.bf16.mxu0 %v1581_v5 }
 0xae7   :  { %2931 = vmatmul.mubr.bf16.vlgmr.msra.gmra.mxu0 %v1591_v4 }
 0xae8   :  { %2934 = vmatprep.mubr.bf16.mxu0 %v1592_v11  ;;  %2939 = vmatpush3.bf16.msra.mxu0 %v1581_v5 }
 0xae9   :  { %2940 = vmatprep.subr.bf16.mxu0 %v1580_v12 }
 0xaec   :  { %2941 = vmatpush3.bf16.msra.mxu0 %v1580_v12 }
 0xaef   :  { %2935 = vmatmul.mubr.bf16.gmra.mxu0 %v1593_v19 }
 0xba7   :  { %v2932_v20 = vpop.f32.mrf.mxu0 }
 0xba8   :  { %v1637_v18 = vadd.f32 %v2932_v20, %v3577_v30 }
 0xba9   :  { %v1628_v37 = vpop.f32.mrf.mxu0 }
 0xbaa   :  { %v1629_v35 = vadd.f32 %v1628_v37, %v3575_v29  ;;  %v1665_v42 = vsel %vm578_vm7, %v1637_v18, -inf }
 0xbab   :  { %v2933_v26 = vpop.f32.mrf.mxu0 }
 0xbac   :  { %v1659_v24 = vsel %vm578_vm7, %v1629_v35, -inf  ;;  %v1640_v40 = vadd.f32 %v2933_v26, %v3577_v30 }
 0xbad   :  { %v1631_v38 = vpop.f32.mrf.mxu0  ;;  %1660 = vmax.xlane.f32.xlu0 %v1659_v24 }
 0xbae   :  { %v1632_v39 = vadd.f32 %v1631_v38, %v3575_v29  ;;  %v1668_v48 = vsel %vm578_vm7, %v1640_v40, -inf }
 0xbaf   :  { %v2936_v7 = vpop.f32.mrf.mxu0 }
 0xbb0   :  { %v1662_v41 = vsel %vm578_vm7, %v1632_v39, -inf  ;;  %v1653_v47 = vadd.f32 %v2936_v7, %v3577_v30 }
 0xbb1   :  { %v1644_v46 = vpop.f32.mrf.mxu0  ;;  %1663 = vmax.xlane.f32.xlu1 %v1662_v41  ;;  %1666 = vmax.xlane.f32.xlu0 %v1665_v42 }
 0xbb2   :  { %v1645_v49 = vadd.f32 %v1644_v46, %v3575_v29  ;;  %v1677_v55 = vsel %vm578_vm7, %v1653_v47, -inf }
 0xbb3   :  { %v2937_v50 = vpop.f32.mrf.mxu0 }
 0xbb4   :  { %v1671_v51 = vsel %vm578_vm7, %v1645_v49, -inf  ;;  %v1656_v53 = vadd.f32 %v2937_v50, %v3577_v30  ;;  %v3124_v50 = vld [vmem:[%s4002_s4 + $0x78] sm:$0xff]  }
 0xbb5   :  { %v1647_v52 = vpop.f32.mrf.mxu0  ;;  %1669 = vmax.xlane.f32.xlu1 %v1668_v48  ;;  %1672 = vmax.xlane.f32.xlu0 %v1671_v51  ;;  %v3126_v48 = vld [vmem:[%s4002_s4 + $0x68] sm:$0xff]  }
 0xbb6   :  { %v1648_v43 = vadd.f32 %v1647_v52, %v3575_v29  ;;  %v1680_v56 = vsel %vm578_vm7, %v1656_v53, -inf  ;;  %2950 = vmatprep.subr.bf16.mxu1 %v3124_v50 }
 0xbb7   :  { %2951 = vmatpush3.bf16.msra.mxu1 %v3124_v50 }
 0xbb8   :  { %v1674_v54 = vsel %vm578_vm7, %v1648_v43, -inf }
 0xbb9   :  { %1675 = vmax.xlane.f32.xlu1 %v1674_v54  ;;  %1678 = vmax.xlane.f32.xlu0 %v1677_v55 }
 0xbbd   :  { %1681 = vmax.xlane.f32.xlu1 %v1680_v56 }
 0xc36   :  { %v1661_v57 = vpop.xlane.xlu0 %1660 }
 0xc37   :  { %v1683_v58 = vsub.f32 %v1629_v35, %v1661_v57 }
 0xc39   :  { %v1691_v59 = vmul.f32 1.442695, %v1683_v58 }
 0xc3a   :  { %v1664_v25 = vpop.xlane.xlu1 %1663  ;;  %v1667_v60 = vpop.xlane.xlu0 %1666 }
 0xc3b   :  { %3220 = vpow2.f32 %v1691_v59  ;;  %v1684_v62 = vsub.f32 %v1632_v39, %v1664_v25  ;;  %v1685_v21 = vsub.f32 %v1637_v18, %v1667_v60 }
 0xc3d   :  { %v1693_v29 = vmul.f32 1.442695, %v1684_v62  ;;  %v1695_v63 = vmul.f32 1.442695, %v1685_v21 }
 0xc3e   :  { %v1670_v30 = vpop.xlane.xlu1 %1669  ;;  %v1673_v33 = vpop.xlane.xlu0 %1672 }
 0xc3f   :  { %3222 = vpow2.f32 %v1693_v29  ;;  %v1686_v0 = vsub.f32 %v1640_v40, %v1670_v30  ;;  %v1687_v5 = vsub.f32 %v1645_v49, %v1673_v33 }
 0xc40   :  { %3224 = vpow2.f32 %v1695_v63 }
 0xc41   :  { %v1697_v6 = vmul.f32 1.442695, %v1686_v0  ;;  %v1699_v10 = vmul.f32 1.442695, %v1687_v5 }
 0xc42   :  { %v1676_v14 = vpop.xlane.xlu1 %1675  ;;  %v1679_v15 = vpop.xlane.xlu0 %1678 }
 0xc43   :  { %3226 = vpow2.f32 %v1697_v6  ;;  %v1688_v16 = vsub.f32 %v1648_v43, %v1676_v14  ;;  %v1689_v1 = vsub.f32 %v1653_v47, %v1679_v15  ;;  %v3125_v47 = vld [vmem:[%s4002_s4 + $0x70] sm:$0xff]  }
 0xc44   :  { %3228 = vpow2.f32 %v1699_v10  ;;  %2952 = vmatprep.subr.bf16.mxu1 %v3125_v47 }
 0xc45   :  { %v1701_v22 = vmul.f32 1.442695, %v1688_v16  ;;  %v1703_v4 = vmul.f32 1.442695, %v1689_v1  ;;  %2953 = vmatpush3.bf16.msra.mxu1 %v3125_v47 }
 0xc46   :  { %v1682_v11 = vpop.xlane.xlu1 %1681  ;;  %2954 = vmatprep.subr.bf16.mxu1 %v3126_v48 }
 0xc47   :  { %3230 = vpow2.f32 %v1701_v22  ;;  %v1690_v12 = vsub.f32 %v1656_v53, %v1682_v11  ;;  %v3127_v11 = vld [vmem:[%s4002_s4 + $0x60] sm:$0xff]  }
 0xc48   :  { %v3221_v23 = vpop.eup %3220  ;;  %3232 = vpow2.f32 %v1703_v4 }
 0xc49   :  { %v1705_v3 = vmul.f32 1.442695, %v1690_v12  ;;  %v1707_v19 = vsel %vm578_vm7, %v3221_v23, 0.0  ;;  %2955 = vmatpush3.bf16.msra.mxu1 %v3126_v48  ;;  %v3128_v12 = vld [vmem:[%s4002_s4 + $0x58] sm:$0xff]  }
 0xc4a   :  { %1708 = vadd.xlane.f32.xlu0 %v1707_v19  ;;  %2956 = vmatprep.subr.bf16.mxu1 %v3127_v11  ;;  %v3131_v19 = vld [vmem:[%s4002_s4 + $0x40] sm:$0xff]  }
 0xc4b   :  { %3234 = vpow2.f32 %v1705_v3  ;;  %v3130_v3 = vld [vmem:[%s4002_s4 + $0x48] sm:$0xff]  }
 0xc4c   :  { %v3223_v20 = vpop.eup %3222 }
 0xc4d   :  { %v3225_v37 = vpop.eup %3224  ;;  %v1710_v35 = vsel %vm578_vm7, %v3223_v20, 0.0  ;;  %2957 = vmatpush3.bf16.msra.mxu1 %v3127_v11 }
 0xc4e   :  { %1711 = vadd.xlane.f32.xlu1 %v1710_v35  ;;  %v1713_v26 = vsel %vm578_vm7, %v3225_v37, 0.0  ;;  %2958 = vmatprep.subr.bf16.mxu1 %v3128_v12 }
 0xc4f   :  { %1714 = vadd.xlane.f32.xlu0 %v1713_v26 }
 0xc50   :  { %v3227_v18 = vpop.eup %3226 }
 0xc51   :  { %v3229_v24 = vpop.eup %3228  ;;  %v1716_v38 = vsel %vm578_vm7, %v3227_v18, 0.0  ;;  %2959 = vmatpush3.bf16.msra.mxu1 %v3128_v12 }
 0xc52   :  { %1717 = vadd.xlane.f32.xlu1 %v1716_v38  ;;  %v1719_v39 = vsel %vm578_vm7, %v3229_v24, 0.0 }
 0xc53   :  { %1720 = vadd.xlane.f32.xlu0 %v1719_v39 }
 0xc54   :  { %v3231_v7 = vpop.eup %3230 }
 0xc55   :  { %v3233_v40 = vpop.eup %3232  ;;  %v1722_v41 = vsel %vm578_vm7, %v3231_v7, 0.0 }
 0xc56   :  { %1723 = vadd.xlane.f32.xlu1 %v1722_v41  ;;  %v1725_v42 = vsel %vm578_vm7, %v3233_v40, 0.0 }
 0xc57   :  { %1726 = vadd.xlane.f32.xlu0 %v1725_v42 }
 0xc58   :  { %v3235_v46 = vpop.eup %3234 }
 0xc59   :  { %v1728_v49 = vsel %vm578_vm7, %v3235_v46, 0.0 }
 0xc5a   :  { %1729 = vadd.xlane.f32.xlu1 %v1728_v49 }
 0xcd3   :  { %v1709_v51 = vpop.xlane.xlu0 %1708 }
 0xcd4   :  { %3236 = vrcp.f32 %v1709_v51 }
 0xcd7   :  { %v1712_v52 = vpop.xlane.xlu1 %1711 }
 0xcd8   :  { %3238 = vrcp.f32 %v1712_v52  ;;  %v1715_v43 = vpop.xlane.xlu0 %1714 }
 0xcd9   :  { %3240 = vrcp.f32 %v1715_v43 }
 0xcdb   :  { %v1718_v53 = vpop.xlane.xlu1 %1717 }
 0xcdc   :  { %3242 = vrcp.f32 %v1718_v53  ;;  %v1721_v54 = vpop.xlane.xlu0 %1720 }
 0xcdd   :  { %3244 = vrcp.f32 %v1721_v54 }
 0xcdf   :  { %v1724_v55 = vpop.xlane.xlu1 %1723 }
 0xce0   :  { %3246 = vrcp.f32 %v1724_v55  ;;  %v1727_v56 = vpop.xlane.xlu0 %1726  ;;  %v3902_v55 = vld [vmem:[%s4000_s2 + $0x10] sm:$0xff] }
 0xce1   :  { %3248 = vrcp.f32 %v1727_v56  ;;  %v3237_v57 = vpop.eup %3236 }
 0xce2   :  { %v1739_v25 = vmul.f32 %v3237_v57, %v3221_v23  ;;  %v3129_v23 = vld [vmem:[%s4002_s4 + $0x50] sm:$0xff]   ;;  %v1862_v57 = vrot.slane %v3902_v55, %v3501_v2 }
 0xce3   :  { %v1730_v58 = vpop.xlane.xlu1 %1729  ;;  %2960 = vmatprep.subr.bf16.mxu1 %v3129_v23 }
 0xce4   :  { %3250 = vrcp.f32 %v1730_v58  ;;  %2961 = vmatpush3.bf16.msra.mxu1 %v3129_v23 }
 0xce5   :  { %v3239_v59 = vpop.eup %3238  ;;  %2962 = vmatprep.subr.bf16.mxu1 %v3130_v3 }
 0xce6   :  { %v1740_v60 = vmul.f32 %v3239_v59, %v3223_v20  ;;  %v3241_v62 = vpop.eup %3240 }
 0xce7   :  { %v1741_v63 = vmul.f32 %v3241_v62, %v3225_v37 }
 0xce8   :  { %v1747_v21 = vpack.c.bf16 %v1740_v60, %v1739_v25  ;;  %2963 = vmatpush3.bf16.msra.mxu1 %v3130_v3 }
 0xce9   :  { %v3243_v29 = vpop.eup %3242  ;;  %2964 = vmatprep.subr.bf16.mxu1 %v3131_v19 }
 0xcea   :  { %v1742_v30 = vmul.f32 %v3243_v29, %v3227_v18  ;;  %2942 = vmatprep.mubr.msk.bf16.mxu0 %vm578_vm7, %v1747_v21  ;;  %v3245_v33 = vpop.eup %3244 }
 0xceb   :  { %v1743_v6 = vmul.f32 %v3245_v33, %v3229_v24 }
 0xcec   :  { %v1748_v0 = vpack.c.bf16 %v1742_v30, %v1741_v63  ;;  %2965 = vmatpush3.bf16.msra.mxu1 %v3131_v19  ;;  %v3132_v19 = vld [vmem:[%s4003_s5 + $0x78] sm:$0xff]  }
 0xced   :  { %v3247_v5 = vpop.eup %3246  ;;  %2970 = vmatprep.subr.bf16.mxu0 %v3132_v19 }
 0xcee   :  { %2943 = vmatmul.mubr.msk.bf16.vlgmr.msra.gmra.mxu0 %vm578_vm7, %v1748_v0  ;;  %v1744_v10 = vmul.f32 %v3247_v5, %v3231_v7  ;;  %v3249_v14 = vpop.eup %3248 }
 0xcef   :  { %v1745_v1 = vmul.f32 %v3249_v14, %v3233_v40  ;;  %2971 = vmatpush3.bf16.msra.mxu0 %v3132_v19 }
 0xcf0   :  { %v1749_v15 = vpack.c.bf16 %v1744_v10, %v1743_v6 }
 0xcf1   :  { %v3251_v16 = vpop.eup %3250 }
 0xcf2   :  { %2946 = vmatprep.mubr.msk.bf16.mxu0 %vm578_vm7, %v1749_v15  ;;  %v1746_v22 = vmul.f32 %v3251_v16, %v3235_v46 }
 0xcf4   :  { %v1750_v4 = vpack.c.bf16 %v1746_v22, %v1745_v1 }
 0xcf6   :  { %2947 = vmatmul.mubr.msk.bf16.gmra.mxu0 %vm578_vm7, %v1750_v4 }
 0xdae   :  { %v2944_v20 = vpop.f32.mrf.mxu0 }
 0xdaf   :  { %v1830_v47 = vmul.f32 %v2944_v20, %v3544_v34  ;;  %v3133_v20 = vld [vmem:[%s4003_s5 + $0x70] sm:$0xff]  }
 0xdb0   :  { %v1797_v37 = vpop.f32.mrf.mxu0  ;;  %2972 = vmatprep.subr.bf16.mxu0 %v3133_v20 }
 0xdb1   :  { %v1828_v46 = vmul.f32 %v3544_v34, %v1797_v37  ;;  %2973 = vmatpush3.bf16.msra.mxu0 %v3133_v20  ;;  %v3134_v37 = vld [vmem:[%s4003_s5 + $0x68] sm:$0xff]  }
 0xdb2   :  { %v2945_v35 = vpop.f32.mrf.mxu0  ;;  %2974 = vmatprep.subr.bf16.mxu0 %v3134_v37 }
 0xdb3   :  { %v1831_v40 = vmul.f32 %v2945_v35, %v3544_v34  ;;  %v3135_v35 = vld [vmem:[%s4003_s5 + $0x60] sm:$0xff]  }
 0xdb4   :  { %v1800_v26 = vpop.f32.mrf.mxu0 }
 0xdb5   :  { %v1829_v49 = vmul.f32 %v3544_v34, %v1800_v26  ;;  %2975 = vmatpush3.bf16.msra.mxu0 %v3134_v37  ;;  %v3136_v26 = vld [vmem:[%s4003_s5 + $0x58] sm:$0xff]  }
 0xdb6   :  { %v2948_v18 = vpop.f32.mrf.mxu0  ;;  %2976 = vmatprep.subr.bf16.mxu0 %v3135_v35 }
 0xdb7   :  { %v1834_v41 = vmul.f32 %v2948_v18, %v3559_v8  ;;  %v3137_v18 = vld [vmem:[%s4003_s5 + $0x50] sm:$0xff]  }
 0xdb8   :  { %v1813_v24 = vpop.f32.mrf.mxu0 }
 0xdb9   :  { %v1832_v39 = vmul.f32 %v3559_v8, %v1813_v24  ;;  %v1838_v43 = vadd.f32 %v1834_v41, %v1830_v47  ;;  %2977 = vmatpush3.bf16.msra.mxu0 %v3135_v35  ;;  %v3138_v24 = vld [vmem:[%s4003_s5 + $0x48] sm:$0xff]  }
 0xdba   :  { %v2949_v38 = vpop.f32.mrf.mxu0  ;;  %2978 = vmatprep.subr.bf16.mxu0 %v3136_v26 }
 0xdbb   :  { %v1835_v7 = vmul.f32 %v2949_v38, %v3559_v8  ;;  %v1836_v51 = vadd.f32 %v1832_v39, %v1828_v46  ;;  %v3139_v38 = vld [vmem:[%s4003_s5 + $0x40] sm:$0xff]  }
 0xdbc   :  { %v1816_v42 = vpop.f32.mrf.mxu0 }
 0xdbd   :  { %v1833_v50 = vmul.f32 %v3559_v8, %v1816_v42  ;;  %v1839_v48 = vadd.f32 %v1835_v7, %v1831_v40  ;;  %2979 = vmatpush3.bf16.msra.mxu0 %v3136_v26 }
 0xdbe   :  { %2980 = vmatprep.subr.bf16.mxu0 %v3137_v18 }
 0xdbf   :  { %v1837_v52 = vadd.f32 %v1833_v50, %v1829_v49  ;;  %v1841_v54 = vpack.c.bf16 %v1839_v48, %v1838_v43 }
 0xdc1   :  { %v1840_v53 = vpack.c.bf16 %v1837_v52, %v1836_v51  ;;  %2981 = vmatpush3.bf16.msra.mxu0 %v3137_v18 }
 0xdc2   :  { %2982 = vmatprep.subr.bf16.mxu0 %v3138_v24 }
 0xdc3   :  { %2966 = vmatprep.mubr.bf16.mxu1 %v1840_v53 }
 0xdc4   :  { %2967 = vmatmul.mubr.bf16.vlgmr.msra.gmra.mxu1 %v1841_v54  ;;  %v2015_v54 = vrot.slane %v3902_v55, %v3512_v9 }
 0xdc5   :  { %2983 = vmatpush3.bf16.msra.mxu0 %v3138_v24 }
 0xdc6   :  { %2984 = vmatprep.subr.bf16.mxu0 %v3139_v38 }
 0xdc9   :  { %2985 = vmatpush3.bf16.msra.mxu0 %v3139_v38 }
 0xe84   :  { %v2968_v56 = vpop.f32.mrf.mxu1 }
 0xe85   :  { %v1954_v59 = vadd.f32 %v2968_v56, %v1862_v57 }
 0xe86   :  { %v1945_v8 = vpop.f32.mrf.mxu1 }
 0xe87   :  { %v1946_v58 = vadd.f32 %v1945_v8, %v1862_v57  ;;  %v1962_v63 = vadd.f32 %v1954_v59, %v3817_v17 }
 0xe88   :  { %v2969_v34 = vpop.f32.mrf.mxu1 }
 0xe89   :  { %v1960_v25 = vadd.f32 %v1946_v58, %v3810_v32  ;;  %v1957_v21 = vadd.f32 %v2969_v34, %v1862_v57  ;;  %v2023_v34 = vrot.slane %v3902_v55, %v3703_v44 }
 0xe8a   :  { %v1948_v60 = vpop.f32.mrf.mxu1 }
 0xe8b   :  { %v1949_v62 = vadd.f32 %v1948_v60, %v1862_v57  ;;  %1964 = vadd.xlane.f32.xlu0 %v1960_v25  ;;  %v1963_v30 = vadd.f32 %v1957_v21, %v3819_v28 }
 0xe8d   :  { %v1961_v29 = vadd.f32 %v1949_v62, %v3812_v36 }
 0xe8f   :  { %1966 = vadd.xlane.f32.xlu1 %v1961_v29  ;;  %1968 = vadd.xlane.f32.xlu0 %v1962_v63 }
 0xe93   :  { %1970 = vadd.xlane.f32.xlu1 %v1963_v30 }
 0xf14   :  { %v1965_v2 = vpop.xlane.xlu0 %1964 }
 0xf15   :  { %v1972_v33 = vmul.f32 0.015625, %v1965_v2 }
 0xf17   :  { %v1976_v0 = vsub.f32 %v1960_v25, %v1972_v33 }
 0xf18   :  { %v1967_v5 = vpop.xlane.xlu1 %1966  ;;  %v1969_v6 = vpop.xlane.xlu0 %1968 }
 0xf19   :  { %v1973_v10 = vmul.f32 0.015625, %v1967_v5  ;;  %v1974_v32 = vmul.f32 0.015625, %v1969_v6  ;;  %v1980_v14 = vmul.f32 %v3408_v13, %v1976_v0  ;;  %v3140_v5 = vld [vmem:[#allocation2 + $0x78] sm:$0xff]   ;;  %v3141_v6 = vld [vmem:[#allocation2 + $0x70] sm:$0xff]  }
 0xf1a   :  { %2990 = vmatprep.subr.bf16.mxu1 %v3140_v5 }
 0xf1b   :  { %v1977_v15 = vsub.f32 %v1961_v29, %v1973_v10  ;;  %v1978_v16 = vsub.f32 %v1962_v63, %v1974_v32  ;;  %v1984_v1 = vmul.f32 %v1980_v14, %v1980_v14  ;;  %2991 = vmatpush3.bf16.msra.mxu1 %v3140_v5  ;;  %v3142_v10 = vld [vmem:[#allocation2 + $0x68] sm:$0xff]   ;;  %v3143_v32 = vld [vmem:[#allocation2 + $0x60] sm:$0xff]  }
 0xf1c   :  { %v1971_v36 = vpop.xlane.xlu1 %1970  ;;  %2992 = vmatprep.subr.bf16.mxu1 %v3141_v6 }
 0xf1d   :  { %v1975_v22 = vmul.f32 0.015625, %v1971_v36  ;;  %1988 = vadd.xlane.f32.xlu0 %v1984_v1  ;;  %v1981_v17 = vmul.f32 %v3408_v13, %v1977_v15  ;;  %v1982_v28 = vmul.f32 %v3408_v13, %v1978_v16  ;;  %v3145_v15 = vld [vmem:[#allocation2 + $0x50] sm:$0xff]   ;;  %v3146_v16 = vld [vmem:[#allocation2 + $0x48] sm:$0xff]   ;;  %v3147_v1 = vld [vmem:[#allocation2 + $0x40] sm:$0xff]   ;;  %v2050_v36 = vrot.slane %v3902_v55, %v3533_v27 }
 0xf1f   :  { %v1979_v4 = vsub.f32 %v1963_v30, %v1975_v22  ;;  %v1985_v11 = vmul.f32 %v1981_v17, %v1981_v17  ;;  %v1986_v12 = vmul.f32 %v1982_v28, %v1982_v28  ;;  %2993 = vmatpush3.bf16.msra.mxu1 %v3141_v6 }
 0xf20   :  { %2994 = vmatprep.subr.bf16.mxu1 %v3142_v10 }
 0xf21   :  { %1990 = vadd.xlane.f32.xlu1 %v1985_v11  ;;  %1992 = vadd.xlane.f32.xlu0 %v1986_v12  ;;  %v1983_v23 = vmul.f32 %v3408_v13, %v1979_v4 }
 0xf23   :  { %v1987_v3 = vmul.f32 %v1983_v23, %v1983_v23  ;;  %2995 = vmatpush3.bf16.msra.mxu1 %v3142_v10  ;;  %v2206_v10 = vrot.slane %v3902_v55, %v3551_v45 }
 0xf24   :  { %2996 = vmatprep.subr.bf16.mxu1 %v3143_v32 }
 0xf25   :  { %1994 = vadd.xlane.f32.xlu1 %v1987_v3 }
 0xf27   :  { %2997 = vmatpush3.bf16.msra.mxu1 %v3143_v32 }
 0xfa6   :  { %v1989_v39 = vpop.xlane.xlu0 %1988 }
 0xfa7   :  { %v1996_v7 = vmul.f32 0.015625, %v1989_v39 }
 0xfa9   :  { %v2000_v40 = vadd.f32 1e-12, %v1996_v7 }
 0xfaa   :  { %v1991_v41 = vpop.xlane.xlu1 %1990  ;;  %v1993_v42 = vpop.xlane.xlu0 %1992 }
 0xfab   :  { %3252 = vrsqrt.f32 %v2000_v40  ;;  %v1997_v46 = vmul.f32 0.015625, %v1991_v41  ;;  %v1998_v49 = vmul.f32 0.015625, %v1993_v42 }
 0xfad   :  { %v2001_v50 = vadd.f32 1e-12, %v1997_v46  ;;  %v2002_v47 = vadd.f32 1e-12, %v1998_v49 }
 0xfae   :  { %v1995_v48 = vpop.xlane.xlu1 %1994 }
 0xfaf   :  { %3254 = vrsqrt.f32 %v2001_v50  ;;  %v1999_v51 = vmul.f32 0.015625, %v1995_v48 }
 0xfb0   :  { %3256 = vrsqrt.f32 %v2002_v47 }
 0xfb1   :  { %v2003_v52 = vadd.f32 1e-12, %v1999_v51 }
 0xfb3   :  { %3258 = vrsqrt.f32 %v2003_v52 }
 0xfb8   :  { %v3253_v43 = vpop.eup %3252 }
 0xfb9   :  { %v2008_v53 = vmul.f32 %v3253_v43, %v1980_v14  ;;  %v3144_v14 = vld [vmem:[#allocation2 + $0x58] sm:$0xff]  }
 0xfba   :  { %2998 = vmatprep.subr.bf16.mxu1 %v3144_v14 }
 0xfbb   :  { %v2016_v58 = vmul.f32 %v2015_v54, %v2008_v53  ;;  %2999 = vmatpush3.bf16.msra.mxu1 %v3144_v14 }
 0xfbc   :  { %v3255_v56 = vpop.eup %3254  ;;  %3000 = vmatprep.subr.bf16.mxu1 %v3145_v15 }
 0xfbd   :  { %v3257_v57 = vpop.eup %3256  ;;  %v2009_v8 = vmul.f32 %v3255_v56, %v1981_v17  ;;  %v3942_v21 = vadd.f32 %v2023_v34, %v2016_v58 }
 0xfbe   :  { %v2010_v59 = vmul.f32 %v3257_v57, %v1982_v28 }
 0xfbf   :  { %v2017_v25 = vmul.f32 %v2015_v54, %v2009_v8  ;;  %3001 = vmatpush3.bf16.msra.mxu1 %v3145_v15 }
 0xfc0   :  { %v3259_v60 = vpop.eup %3258  ;;  %v2018_v63 = vmul.f32 %v2015_v54, %v2010_v59  ;;  %3002 = vmatprep.subr.bf16.mxu1 %v3146_v16 }
 0xfc1   :  { %v2011_v62 = vmul.f32 %v3259_v60, %v1983_v23  ;;  %v3944_v29 = vadd.f32 %v2023_v34, %v2017_v25 }
 0xfc2   :  { %v3948_v2 = vadd.f32 %v2023_v34, %v2018_v63 }
 0xfc3   :  { %v2028_v30 = vpack.c.bf16 %v3944_v29, %v3942_v21  ;;  %v2019_v9 = vmul.f32 %v2015_v54, %v2011_v62  ;;  %3003 = vmatpush3.bf16.msra.mxu1 %v3146_v16 }
 0xfc4   :  { %3004 = vmatprep.subr.bf16.mxu1 %v3147_v1 }
 0xfc5   :  { %2986 = vmatprep.mubr.bf16.mxu0 %v2028_v30  ;;  %v3950_v33 = vadd.f32 %v2023_v34, %v2019_v9 }
 0xfc7   :  { %v2029_v0 = vpack.c.bf16 %v3950_v33, %v3948_v2  ;;  %3005 = vmatpush3.bf16.msra.mxu1 %v3147_v1 }
 0xfc9   :  { %2987 = vmatmul.mubr.bf16.vlgmr.msra.gmra.mxu0 %v2029_v0 }
0x1089   :  { %v2988_v22 = vpop.f32.mrf.mxu0 }
0x108a   :  { %v2142_v17 = vadd.f32 %v2988_v22, %v2050_v36 }
0x108b   :  { %v2133_v28 = vpop.f32.mrf.mxu0 }
0x108c   :  { %v2154_v4 = vmul.f32 0.044715, %v2142_v17  ;;  %v2134_v11 = vadd.f32 %v2133_v28, %v2050_v36  ;;  %v2150_v60 = vmul.f32 0.5, %v2142_v17 }
0x108d   :  { %v2989_v12 = vpop.f32.mrf.mxu0 }
0x108e   :  { %v2158_v23 = vmul.f32 %v2154_v4, %v2142_v17  ;;  %v2152_v3 = vmul.f32 0.044715, %v2134_v11  ;;  %v2145_v19 = vadd.f32 %v2989_v12, %v2050_v36  ;;  %v2148_v34 = vmul.f32 0.5, %v2134_v11 }
0x108f   :  { %v2136_v20 = vpop.f32.mrf.mxu0 }
0x1090   :  { %v2162_v37 = vmul.f32 %v2158_v23, %v2142_v17  ;;  %v2156_v35 = vmul.f32 %v2152_v3, %v2134_v11  ;;  %v2155_v26 = vmul.f32 0.044715, %v2145_v19  ;;  %v2137_v18 = vadd.f32 %v2136_v20, %v2050_v36 }
0x1091   :  { %v2151_v8 = vmul.f32 0.5, %v2145_v19 }
0x1092   :  { %v2166_v24 = vadd.f32 %v2162_v37, %v2142_v17  ;;  %v2160_v38 = vmul.f32 %v2156_v35, %v2134_v11  ;;  %v2159_v39 = vmul.f32 %v2155_v26, %v2145_v19  ;;  %v2153_v7 = vmul.f32 0.044715, %v2137_v18 }
0x1093   :  { %v2149_v59 = vmul.f32 0.5, %v2137_v18 }
0x1094   :  { %v2163_v40 = vmul.f32 %v2159_v39, %v2145_v19  ;;  %v2157_v27 = vmul.f32 %v2153_v7, %v2137_v18  ;;  %v2164_v41 = vadd.f32 %v2160_v38, %v2134_v11  ;;  %v2170_v42 = vmul.f32 0.7978846, %v2166_v24 }
0x1096   :  { %v2167_v46 = vadd.f32 %v2163_v40, %v2145_v19  ;;  %v2161_v49 = vmul.f32 %v2157_v27, %v2137_v18  ;;  %v2168_v50 = vmul.f32 0.7978846, %v2164_v41  ;;  %v3148_v41 = vld [vmem:[#allocation4 + $0x38] sm:$0xff]  }
0x1097   :  { %3010 = vmatprep.subr.bf16.mxu0 %v3148_v41 }
0x1098   :  { %v2171_v47 = vmul.f32 0.7978846, %v2167_v46  ;;  %v2165_v48 = vadd.f32 %v2161_v49, %v2137_v18  ;;  %3260 = vtanh.f32 %v2168_v50  ;;  %3011 = vmatpush3.bf16.msra.mxu0 %v3148_v41  ;;  %v3150_v46 = vld [vmem:[#allocation4 + $0x28] sm:$0xff]   ;;  %v3151_v49 = vld [vmem:[#allocation4 + $0x20] sm:$0xff]   ;;  %v3152_v50 = vld [vmem:[#allocation4 + $0x18] sm:$0xff]  }
0x1099   :  { %3262 = vtanh.f32 %v2170_v42  ;;  %v3149_v42 = vld [vmem:[#allocation4 + $0x30] sm:$0xff]  }
0x109a   :  { %3264 = vtanh.f32 %v2171_v47  ;;  %v2169_v51 = vmul.f32 0.7978846, %v2165_v48  ;;  %3012 = vmatprep.subr.bf16.mxu0 %v3149_v42  ;;  %v3153_v47 = vld [vmem:[#allocation4 + $0x10] sm:$0xff]   ;;  %v3155_v48 = vld [vmem:[#allocation4] sm:$0xff]  }
0x109c   :  { %3266 = vtanh.f32 %v2169_v51  ;;  %3013 = vmatpush3.bf16.msra.mxu0 %v3149_v42 }
0x109d   :  { %3014 = vmatprep.subr.bf16.mxu0 %v3150_v46 }
0x10a0   :  { %3015 = vmatpush3.bf16.msra.mxu0 %v3150_v46 }
0x10a1   :  { %3016 = vmatprep.subr.bf16.mxu0 %v3151_v49 }
0x10a4   :  { %3017 = vmatpush3.bf16.msra.mxu0 %v3151_v49 }
0x10a5   :  { %v3261_v52 = vpop.eup %3260  ;;  %3018 = vmatprep.subr.bf16.mxu0 %v3152_v50 }
0x10a6   :  { %v3263_v43 = vpop.eup %3262  ;;  %v2176_v54 = vadd.f32 1.0, %v3261_v52 }
0x10a7   :  { %v3265_v53 = vpop.eup %3264  ;;  %v2178_v58 = vadd.f32 1.0, %v3263_v43 }
0x10a8   :  { %v2179_v56 = vadd.f32 1.0, %v3265_v53  ;;  %v2180_v63 = vmul.f32 %v2176_v54, %v2148_v34  ;;  %3019 = vmatpush3.bf16.msra.mxu0 %v3152_v50 }
0x10a9   :  { %v3267_v57 = vpop.eup %3266  ;;  %v2182_v9 = vmul.f32 %v2178_v58, %v2150_v60  ;;  %3020 = vmatprep.subr.bf16.mxu0 %v3153_v47  ;;  %v2359_v60 = vrot.slane %v3902_v55, %v3539_v31 }
0x10aa   :  { %v2177_v25 = vadd.f32 1.0, %v3267_v57  ;;  %v2183_v62 = vmul.f32 %v2179_v56, %v2151_v8 }
0x10ac   :  { %v2181_v30 = vmul.f32 %v2177_v25, %v2149_v59  ;;  %v2185_v5 = vpack.c.bf16 %v2183_v62, %v2182_v9  ;;  %3021 = vmatpush3.bf16.msra.mxu0 %v3153_v47 }
0x10ae   :  { %v2184_v0 = vpack.c.bf16 %v2181_v30, %v2180_v63  ;;  %v2367_v30 = vrot.slane %v3902_v55, %v3640_v61 }
0x10b0   :  { %3006 = vmatprep.mubr.bf16.mxu1 %v2184_v0 }
0x10b1   :  { %3007 = vmatmul.mubr.bf16.vlgmr.msra.gmra.mxu1 %v2185_v5 }
0x1171   :  { %v3008_v6 = vpop.f32.mrf.mxu1 }
0x1172   :  { %v2298_v16 = vadd.f32 %v3008_v6, %v2206_v10 }
0x1173   :  { %v2289_v32 = vpop.f32.mrf.mxu1 }
0x1174   :  { %v2290_v14 = vadd.f32 %v2289_v32, %v2206_v10  ;;  %v2306_v4 = vadd.f32 %v2298_v16, %v3948_v2 }
0x1175   :  { %v3009_v15 = vpop.f32.mrf.mxu1 }
0x1176   :  { %v2304_v1 = vadd.f32 %v2290_v14, %v3942_v21  ;;  %v2301_v17 = vadd.f32 %v3009_v15, %v2206_v10 }
0x1177   :  { %v2292_v36 = vpop.f32.mrf.mxu1 }
0x1178   :  { %v2293_v22 = vadd.f32 %v2292_v36, %v2206_v10  ;;  %2308 = vadd.xlane.f32.xlu0 %v2304_v1  ;;  %v2307_v11 = vadd.f32 %v2301_v17, %v3950_v33 }
0x117a   :  { %v2305_v28 = vadd.f32 %v2293_v22, %v3944_v29 }
0x117c   :  { %2310 = vadd.xlane.f32.xlu1 %v2305_v28  ;;  %2312 = vadd.xlane.f32.xlu0 %v2306_v4 }
0x1180   :  { %2314 = vadd.xlane.f32.xlu1 %v2307_v11 }
0x1201   :  { %v2309_v45 = vpop.xlane.xlu0 %2308 }
0x1202   :  { %v2316_v12 = vmul.f32 0.015625, %v2309_v45 }
0x1204   :  { %v2320_v23 = vsub.f32 %v2304_v1, %v2316_v12 }
0x1205   :  { %v2311_v3 = vpop.xlane.xlu1 %2310  ;;  %v2313_v19 = vpop.xlane.xlu0 %2312 }
0x1206   :  { %v2317_v20 = vmul.f32 0.015625, %v2311_v3  ;;  %v2318_v21 = vmul.f32 0.015625, %v2313_v19  ;;  %v2324_v37 = vmul.f32 %v3408_v13, %v2320_v23 }
0x1208   :  { %v2321_v35 = vsub.f32 %v2305_v28, %v2317_v20  ;;  %v2322_v26 = vsub.f32 %v2306_v4, %v2318_v21  ;;  %v2328_v18 = vmul.f32 %v2324_v37, %v2324_v37  ;;  %v3276_v28 = vld [vmem:[%s4000_s2] sm:$0xff] }
0x1209   :  { %v2315_v29 = vpop.xlane.xlu1 %2314  ;;  %v2397_v4 = vrot.slane %v3276_v28, %v3703_v44 }
0x120a   :  { %v2319_v24 = vmul.f32 0.015625, %v2315_v29  ;;  %2332 = vadd.xlane.f32.xlu0 %v2328_v18  ;;  %v2325_v2 = vmul.f32 %v3408_v13, %v2321_v35  ;;  %v2326_v33 = vmul.f32 %v3408_v13, %v2322_v26 }
0x120c   :  { %v2323_v38 = vsub.f32 %v2307_v11, %v2319_v24  ;;  %v2329_v39 = vmul.f32 %v2325_v2, %v2325_v2  ;;  %v2330_v7 = vmul.f32 %v2326_v33, %v2326_v33 }
0x120e   :  { %2334 = vadd.xlane.f32.xlu1 %v2329_v39  ;;  %2336 = vadd.xlane.f32.xlu0 %v2330_v7  ;;  %v2327_v40 = vmul.f32 %v3408_v13, %v2323_v38  ;;  %v3154_v13 = vld [vmem:[#allocation4 + $0x8] sm:$0xff]  }
0x120f   :  { %3022 = vmatprep.subr.bf16.mxu0 %v3154_v13 }
0x1210   :  { %v2331_v27 = vmul.f32 %v2327_v40, %v2327_v40  ;;  %3023 = vmatpush3.bf16.msra.mxu0 %v3154_v13 }
0x1211   :  { %3024 = vmatprep.subr.bf16.mxu0 %v3155_v48 }
0x1212   :  { %2338 = vadd.xlane.f32.xlu1 %v2331_v27 }
0x1214   :  { %3025 = vmatpush3.bf16.msra.mxu0 %v3155_v48 }
0x1293   :  { %v2333_v51 = vpop.xlane.xlu0 %2332 }
0x1294   :  { %v2340_v52 = vmul.f32 0.015625, %v2333_v51 }
0x1296   :  { %v2344_v43 = vadd.f32 1e-12, %v2340_v52 }
0x1297   :  { %v2335_v53 = vpop.xlane.xlu1 %2334  ;;  %v2337_v54 = vpop.xlane.xlu0 %2336 }
0x1298   :  { %3268 = vrsqrt.f32 %v2344_v43  ;;  %v2341_v56 = vmul.f32 0.015625, %v2335_v53  ;;  %v2342_v57 = vmul.f32 0.015625, %v2337_v54 }
0x129a   :  { %v2345_v8 = vadd.f32 1e-12, %v2341_v56  ;;  %v2346_v58 = vadd.f32 1e-12, %v2342_v57 }
0x129b   :  { %v2339_v34 = vpop.xlane.xlu1 %2338 }
0x129c   :  { %3270 = vrsqrt.f32 %v2345_v8  ;;  %v2343_v59 = vmul.f32 0.015625, %v2339_v34 }
0x129d   :  { %3272 = vrsqrt.f32 %v2346_v58 }
0x129e   :  { %v2347_v25 = vadd.f32 1e-12, %v2343_v59 }
0x12a0   :  { %3274 = vrsqrt.f32 %v2347_v25 }
0x12a5   :  { %v3269_v62 = vpop.eup %3268 }
0x12a6   :  { %v2352_v63 = vmul.f32 %v3269_v62, %v2324_v37 }
0x12a8   :  { %v2360_v9 = vmul.f32 %v2359_v60, %v2352_v63 }
0x12a9   :  { %v3271_v0 = vpop.eup %3270 }
0x12aa   :  { %v3273_v5 = vpop.eup %3272  ;;  %v2353_v6 = vmul.f32 %v3271_v0, %v2325_v2  ;;  %v2368_v10 = vadd.f32 %v2367_v30, %v2360_v9 }
0x12ab   :  { %v2354_v32 = vmul.f32 %v3273_v5, %v2326_v33 }
0x12ac   :  { %v2361_v14 = vmul.f32 %v2359_v60, %v2353_v6  ;;  %2372 = vst [vmem:[%s4006_s8] sm:$0xff] %v2368_v10 }
0x12ad   :  { %v3275_v15 = vpop.eup %3274  ;;  %v2362_v16 = vmul.f32 %v2359_v60, %v2354_v32 }
0x12ae   :  { %v2369_v1 = vadd.f32 %v2367_v30, %v2361_v14  ;;  %v2355_v31 = vmul.f32 %v3275_v15, %v2327_v40 }
0x12af   :  { %v2370_v36 = vadd.f32 %v2367_v30, %v2362_v16 }
0x12b0   :  { %2373 = vst [vmem:[%s4006_s8 + $0x8] sm:$0xff] %v2369_v1  ;;  %v2376_v61 = vpack.c.bf16 %v2369_v1, %v2368_v10  ;;  %v2363_v55 = vmul.f32 %v2359_v60, %v2355_v31 }
0x12b1   :  { %2374 = vst [vmem:[%s4006_s8 + $0x10] sm:$0xff] %v2370_v36 }
0x12b2   :  { %3026 = vmatprep.mubr.bf16.mxu0 %v2376_v61  ;;  %v2371_v22 = vadd.f32 %v2367_v30, %v2363_v55 }
0x12b4   :  { %2375 = vst [vmem:[%s4006_s8 + $0x18] sm:$0xff] %v2371_v22  ;;  %v2377_v17 = vpack.c.bf16 %v2371_v22, %v2370_v36 }
0x12b6   :  { %3027 = vmatmul.mubr.bf16.vlgmr.msra.gmra.mxu0 %v2377_v17 }
0x1376   :  { %v3028_v11 = vpop.f32.mrf.mxu0 }
0x1377   :  { %v2489_v45 = vadd.f32 %v3028_v11, %v2397_v4 }
0x1378   :  { %v2480_v12 = vpop.f32.mrf.mxu0 }
0x1379   :  { %2497 = vst [vmem:[%s4007_s9 + $0x10] sm:$0xff] %v2489_v45  ;;  %v2481_v23 = vadd.f32 %v2480_v12, %v2397_v4 }
0x137a   :  { %v3029_v3 = vpop.f32.mrf.mxu0 }
0x137b   :  { %2495 = vst [vmem:[%s4007_s9] sm:$0xff] %v2481_v23  ;;  %v2492_v19 = vadd.f32 %v3029_v3, %v2397_v4 }
0x137c   :  { %v2483_v20 = vpop.f32.mrf.mxu0 }
0x137d   :  { %2498 = vst [vmem:[%s4007_s9 + $0x18] sm:$0xff] %v2492_v19  ;;  %v2484_v44 = vadd.f32 %v2483_v20, %v2397_v4 }
0x137f   :  { %2496 = vst [vmem:[%s4007_s9 + $0x8] sm:$0xff] %v2484_v44 }
0x1380   :  { %2507 = vsyncpa [#allocation3], 1 }
0x1381   :  { %2508 = vsyncpa [#allocation5], 1 }

</bundles_post_ra>
